<compile_context>
chip_gen: v7x
topology: tpu7x:2x2x1
jax: 0.10.0
libtpu: 0.0.40
codegen_flags: <defaults>
</compile_context>

<pallas_src>
import jax
import jax.numpy as jnp
from jax.experimental import pallas as pl
from jax.experimental.pallas import tpu as pltpu

_IN_EPS = 1e-5
_LRELU_SLOPE = 0.2
_MXU_DTYPE = jnp.bfloat16   # MXU operand dtype; accumulation is always f32.


def _lrelu(z):
    return jnp.maximum(z, _LRELU_SLOPE * z)


# ---------------------------------------------------------------------------
# Kernels.  Block shapes:
#   p_ref : (B, K, M)   bf16  transposed im2col patches (K = 16*Cin, M = Ho*Wo)
#   w_ref : (Cout, K)   bf16
#   o_ref : (B, Cout, M)      lane dim is M  -> lane-dense stores
# The static Python loop over the folded samples keeps InstanceNorm stats per-sample.
# ---------------------------------------------------------------------------
def _conv_bias_lrelu_kernel(p_ref, w_ref, b_ref, o_ref):
    w = w_ref[...]
    bias = b_ref[...]                                   # (Cout, 1) f32
    for b in range(p_ref.shape[0]):
        y = jnp.dot(w, p_ref[b], preferred_element_type=jnp.float32)   # (Cout, M)
        o_ref[b] = _lrelu(y + bias).astype(o_ref.dtype)


def _conv_instnorm_lrelu_kernel(p_ref, w_ref, g_ref, be_ref, o_ref):
    w = w_ref[...]
    g = g_ref[...]                                      # (Cout, 1) f32
    be = be_ref[...]
    for b in range(p_ref.shape[0]):
        y = jnp.dot(w, p_ref[b], preferred_element_type=jnp.float32)   # (Cout, M)
        # One-pass per-sample, per-channel stats over the spatial (lane) axis.
        mean = jnp.mean(y, axis=1, keepdims=True)
        msq = jnp.mean(y * y, axis=1, keepdims=True)
        inv = jax.lax.rsqrt(msq - mean * mean + _IN_EPS)
        o_ref[b] = _lrelu((y - mean) * inv * g + be).astype(o_ref.dtype)


def _conv_instnorm_lrelu_head_kernel(p_ref, w_ref, g_ref, be_ref, w5_ref, b5_ref, o_ref):
    # Layer 4 (conv + InstanceNorm + LeakyReLU) with the final 4x4/s2/p0 conv fused:
    # for a 4x4 pre-logit map the final conv is a full dot against w5 (Cout4, 16).
    w = w_ref[...]
    g = g_ref[...]
    be = be_ref[...]
    w5 = w5_ref[...]                                    # (Cout4, 16) f32 (bf16-rounded)
    rows = []
    for b in range(p_ref.shape[0]):
        y = jnp.dot(w, p_ref[b], preferred_element_type=jnp.float32)   # (Cout4, 16)
        mean = jnp.mean(y, axis=1, keepdims=True)
        msq = jnp.mean(y * y, axis=1, keepdims=True)
        inv = jax.lax.rsqrt(msq - mean * mean + _IN_EPS)
        z = _lrelu((y - mean) * inv * g + be)
        zq = z.astype(jnp.bfloat16).astype(jnp.float32)   # mirror bf16 MXU operand rounding
        part = jnp.sum(zq * w5, axis=1, keepdims=True)    # (Cout4, 1)
        rows.append(jnp.sum(part, axis=0, keepdims=True)) # (1, 1)
    o_ref[...] = jnp.concatenate(rows, axis=0) + b5_ref[...]


# ---------------------------------------------------------------------------
# Wrapper-side prep (pure data movement) + pallas_call glue
# ---------------------------------------------------------------------------
def _im2col_s2k4_t(x_nchw, pad):
    """stride-2 / kernel-4 transposed im2col: (N,C,H,W) -> (N, 16*C, Ho*Wo) bf16.

    K ordering is (c, kh, kw), matching a plain weight reshape (Cout, Cin*16)."""
    n, c, h, w = x_nchw.shape
    if pad:
        x_nchw = jnp.pad(x_nchw, ((0, 0), (0, 0), (pad, pad), (pad, pad)))
    hp, wp = h + 2 * pad, w + 2 * pad
    ho, wo = (hp - 4) // 2 + 1, (wp - 4) // 2 + 1
    taps = [x_nchw[:, :, kh:kh + 2 * ho - 1:2, kw:kw + 2 * wo - 1:2]
            for kh in range(4) for kw in range(4)]        # each (N, C, Ho, Wo)
    patch = jnp.stack(taps, axis=2).reshape(n, c * 16, ho * wo)
    return patch.astype(_MXU_DTYPE), ho, wo


def _pick_batch_block(n, m, k, cout, bytes_cap=4 << 20):
    """Fold samples per grid step (>= ~512 lane-columns of MXU work per step) while
    keeping the double-buffered bf16 working set under bytes_cap.  Returns a divisor of n."""
    target = max(1, -(-512 // max(m, 1)))
    per_sample = 4 * m * (k + cout)                    # bf16 in + out, double buffered
    target = min(target, max(1, bytes_cap // max(per_sample, 1)))
    best = 1
    for d in range(1, n + 1):
        if n % d == 0 and d <= target:
            best = d
    return best


def _conv_layer(kernel, patch_t, wmat_t, extras, out_dtype):
    n, k, m = patch_t.shape
    c = wmat_t.shape[0]
    b_blk = _pick_batch_block(n, m, k, c)
    in_specs = [pl.BlockSpec((b_blk, k, m), lambda i: (i, 0, 0)),
                pl.BlockSpec((c, k), lambda i: (0, 0))]
    in_specs += [pl.BlockSpec(e.shape, lambda i: (0, 0)) for e in extras]
    return pl.pallas_call(
        kernel,
        out_shape=jax.ShapeDtypeStruct((n, c, m), out_dtype),
        grid=(n // b_blk,),
        in_specs=in_specs,
        out_specs=pl.BlockSpec((b_blk, c, m), lambda i: (i, 0, 0)),
        compiler_params=pltpu.CompilerParams(dimension_semantics=("parallel",)),
    )(patch_t, wmat_t, *extras)


def conv_bias_lrelu(x_nchw, w, bias, *, pad):
    patch, ho, wo = _im2col_s2k4_t(x_nchw, pad)
    wmat = w.reshape(w.shape[0], -1).astype(_MXU_DTYPE)
    out = _conv_layer(_conv_bias_lrelu_kernel, patch, wmat,
                      [bias.reshape(-1, 1).astype(jnp.float32)], _MXU_DTYPE)
    return out.reshape(x_nchw.shape[0], w.shape[0], ho, wo)    # NCHW bf16


def conv_instnorm_lrelu(x_nchw, w, gamma, beta, *, pad):
    patch, ho, wo = _im2col_s2k4_t(x_nchw, pad)
    wmat = w.reshape(w.shape[0], -1).astype(_MXU_DTYPE)
    out = _conv_layer(_conv_instnorm_lrelu_kernel, patch, wmat,
                      [gamma.reshape(-1, 1).astype(jnp.float32),
                       beta.reshape(-1, 1).astype(jnp.float32)], _MXU_DTYPE)
    return out.reshape(x_nchw.shape[0], w.shape[0], ho, wo)    # NCHW bf16


def conv_instnorm_lrelu_head(x_nchw, w, gamma, beta, w5, b5, *, pad):
    """Layer 4 block with the trivial final conv (layer 5) fused into the epilogue."""
    patch, ho, wo = _im2col_s2k4_t(x_nchw, pad)
    # TODO(synk): for img_size != 64 the final conv output is not 1x1; fall back to a
    # separate conv kernel in that case.
    assert ho == 4 and wo == 4, "fused head assumes img_size == 64 (4x4 pre-logit map)"
    n, k = patch.shape[0], patch.shape[1]
    c4 = w.shape[0]
    wmat = w.reshape(c4, -1).astype(_MXU_DTYPE)
    w5_mat = w5.reshape(c4, 16).astype(_MXU_DTYPE).astype(jnp.float32)
    extras = [gamma.reshape(-1, 1).astype(jnp.float32),
              beta.reshape(-1, 1).astype(jnp.float32),
              w5_mat,
              b5.reshape(1, 1).astype(jnp.float32)]
    in_specs = [pl.BlockSpec((n, k, 16), lambda i: (0, 0, 0)),
                pl.BlockSpec((c4, k), lambda i: (0, 0))]
    in_specs += [pl.BlockSpec(e.shape, lambda i: (0, 0)) for e in extras]
    return pl.pallas_call(
        _conv_instnorm_lrelu_head_kernel,
        out_shape=jax.ShapeDtypeStruct((n, 1), jnp.float32),
        grid=(1,),
        in_specs=in_specs,
        out_specs=pl.BlockSpec((n, 1), lambda i: (0, 0)),
        compiler_params=pltpu.CompilerParams(dimension_semantics=("arbitrary",)),
    )(patch, wmat, *extras)


# ---------------------------------------------------------------------------
# Discriminator: parameters + forward (matches the PyTorch module semantics)
# ---------------------------------------------------------------------------
def init_discriminator_params(key, channels_img, features_d, num_classes, img_size):
    ks = jax.random.split(key, 14)
    fd = features_d

    def cw(k, cout, cin):   # PyTorch Conv2d weight layout (Cout, Cin, K, K)
        return 0.05 * jax.random.normal(k, (cout, cin, 4, 4), jnp.float32)

    return {
        "embed": 0.1 * jax.random.normal(ks[0], (num_classes, img_size * img_size), jnp.float32),
        "w1": cw(ks[1], fd, channels_img + 1),
        "b1": 0.05 * jax.random.normal(ks[2], (fd,), jnp.float32),
        "w2": cw(ks[3], fd * 2, fd),
        "g2": 1.0 + 0.1 * jax.random.normal(ks[4], (fd * 2,), jnp.float32),
        "be2": 0.1 * jax.random.normal(ks[5], (fd * 2,), jnp.float32),
        "w3": cw(ks[6], fd * 4, fd * 2),
        "g3": 1.0 + 0.1 * jax.random.normal(ks[7], (fd * 4,), jnp.float32),
        "be3": 0.1 * jax.random.normal(ks[8], (fd * 4,), jnp.float32),
        "w4": cw(ks[9], fd * 8, fd * 4),
        "g4": 1.0 + 0.1 * jax.random.normal(ks[10], (fd * 8,), jnp.float32),
        "be4": 0.1 * jax.random.normal(ks[11], (fd * 8,), jnp.float32),
        "w5": cw(ks[12], 1, fd * 8),
        "b5": 0.05 * jax.random.normal(ks[13], (1,), jnp.float32),
    }


def discriminator_forward(params, x, labels):
    # x: (N, channels_img, H, W) NCHW f32, labels: (N,) int32
    n, _, h, w = x.shape
    emb = params["embed"][labels].reshape(n, 1, h, w)          # embedding gather (XLA glue)
    hx = jnp.concatenate([x, emb], axis=1)                     # NCHW (N, C+1, H, W)

    hx = conv_bias_lrelu(hx, params["w1"], params["b1"], pad=1)                      # H/2
    hx = conv_instnorm_lrelu(hx, params["w2"], params["g2"], params["be2"], pad=1)   # H/4
    hx = conv_instnorm_lrelu(hx, params["w3"], params["g3"], params["be3"], pad=1)   # H/8
    logits = conv_instnorm_lrelu_head(hx, params["w4"], params["g4"], params["be4"],
                                      params["w5"], params["b5"], pad=1)             # (N, 1)
    return logits.reshape(n, 1, 1, 1)                          # NCHW (N, 1, 1, 1)


# ---------------------------------------------------------------------------
# Pure-JAX reference (identical bf16 operand casting) for a correctness check
# ---------------------------------------------------------------------------
def _reference_forward(params, x, labels):
    n, _, h, w = x.shape
    emb = params["embed"][labels].reshape(n, h, w, 1)
    hx = jnp.concatenate([jnp.transpose(x, (0, 2, 3, 1)), emb], axis=-1)

    def conv(t, wgt, pad):
        return jax.lax.conv_general_dilated(
            t.astype(_MXU_DTYPE),
            jnp.transpose(wgt, (2, 3, 1, 0)).astype(_MXU_DTYPE),
            window_strides=(2, 2), padding=((pad, pad), (pad, pad)),
            dimension_numbers=("NHWC", "HWIO", "NHWC"),
            preferred_element_type=jnp.float32)

    def lrelu(z):
        return jnp.maximum(z, _LRELU_SLOPE * z)

    def instnorm(y, g, b):
        mean = jnp.mean(y, axis=(1, 2), keepdims=True)
        cent = y - mean
        var = jnp.mean(cent * cent, axis=(1, 2), keepdims=True)
        return cent * jax.lax.rsqrt(var + _IN_EPS) * g + b

    hx = lrelu(conv(hx, params["w1"], 1) + params["b1"])
    hx = lrelu(instnorm(conv(hx, params["w2"], 1), params["g2"], params["be2"]))
    hx = lrelu(instnorm(conv(hx, params["w3"], 1), params["g3"], params["be3"]))
    hx = lrelu(instnorm(conv(hx, params["w4"], 1), params["g4"], params["be4"]))
    hx = conv(hx, params["w5"], 0) + params["b5"]
    return jnp.transpose(hx, (0, 3, 1, 2))


if __name__ == "__main__":
    channels_img, features_d = 1, 8
    num_classes, img_size = 4, 64          # img_size=64 is what the final 4x4/s2 conv implies
    batch = 2

    key = jax.random.PRNGKey(0)
    kp, kx, kl = jax.random.split(key, 3)
    params = init_discriminator_params(kp, channels_img, features_d, num_classes, img_size)
    x = jax.random.normal(kx, (batch, channels_img, img_size, img_size), jnp.float32)
    labels = jax.random.randint(kl, (batch,), 0, num_classes, jnp.int32)

    out = jax.block_until_ready(jax.jit(discriminator_forward)(params, x, labels))

    assert out.shape == (batch, 1, 1, 1), out.shape
    assert bool(jnp.all(jnp.isfinite(out)))

    ref = jax.block_until_ready(jax.jit(_reference_forward)(params, x, labels))
    assert jnp.allclose(out, ref, atol=2e-2, rtol=2e-2), (out, ref)

    print("KERNEL_OK")
</pallas_src>

<mosaic_0001>
module attributes {stable_mosaic.version = 11 : i64} {
  func.func @_conv_bias_lrelu_kernel(%arg0: i32, %arg1: memref<1x32x1024xbf16, #tpu.memory_space<vmem>>, %arg2: memref<8x32xbf16, #tpu.memory_space<vmem>>, %arg3: memref<8x1xf32, #tpu.memory_space<vmem>>, %arg4: memref<1x8x1024xbf16, #tpu.memory_space<vmem>>) attributes {dimension_semantics = [#tpu.dimension_semantics<parallel>], iteration_bounds = array<i64: 2>, scalar_prefetch = 0 : i64, scratch_operands = 0 : i64, tpu.core_type = #tpu.core_type<tc>, window_params = [{transform_indices = @transform_0, window_bounds = array<i64: 1, 32, 1024>}, {pipeline_mode = #tpu.pipeline_mode<synchronous>, transform_indices = @transform_1, window_bounds = array<i64: 8, 32>}, {pipeline_mode = #tpu.pipeline_mode<synchronous>, transform_indices = @transform_2, window_bounds = array<i64: 8, 1>}, {transform_indices = @transform_3, window_bounds = array<i64: 1, 8, 1024>}]} {
    %c0 = arith.constant 0 : index
    %c0_0 = arith.constant 0 : index
    %0 = vector.load %arg2[%c0, %c0_0] : memref<8x32xbf16, #tpu.memory_space<vmem>>, vector<8x32xbf16>
    %c0_1 = arith.constant 0 : index
    %c0_2 = arith.constant 0 : index
    %1 = vector.load %arg3[%c0_1, %c0_2] : memref<8x1xf32, #tpu.memory_space<vmem>>, vector<8x1xf32>
    %c0_3 = arith.constant 0 : index
    %c0_4 = arith.constant 0 : index
    %c0_5 = arith.constant 0 : index
    %2 = vector.load %arg1[%c0_3, %c0_4, %c0_5] : memref<1x32x1024xbf16, #tpu.memory_space<vmem>>, vector<1x32x1024xbf16>
    %3 = vector.shape_cast %2 : vector<1x32x1024xbf16> to vector<32x1024xbf16>
    %cst = arith.constant dense<0.000000e+00> : vector<8x1024xf32>
    %4 = tpu.matmul %0, %3, %cst {dimension_numbers = #tpu.dot_dimension_numbers<[1], [0], [0], [1], [0, 0, 1, 1], [], []>} : vector<8x32xbf16>, vector<32x1024xbf16>, vector<8x1024xf32> -> vector<8x1024xf32>
    %5 = vector.broadcast %1 : vector<8x1xf32> to vector<8x1024xf32>
    %6 = arith.addf %4, %5 : vector<8x1024xf32>
    %cst_6 = arith.constant 2.000000e-01 : f32
    %7 = vector.broadcast %cst_6 : f32 to vector<8x1024xf32>
    %8 = arith.mulf %7, %6 : vector<8x1024xf32>
    %9 = arith.maximumf %6, %8 : vector<8x1024xf32>
    %10 = arith.truncf %9 : vector<8x1024xf32> to vector<8x1024xbf16>
    %c0_7 = arith.constant 0 : index
    %c0_8 = arith.constant 0 : index
    %c0_9 = arith.constant 0 : index
    %11 = vector.load %arg4[%c0_7, %c0_8, %c0_9] : memref<1x8x1024xbf16, #tpu.memory_space<vmem>>, vector<1x8x1024xbf16>
    %12 = vector.shape_cast %11 : vector<1x8x1024xbf16> to vector<8x1024xbf16>
    %13 = vector.shape_cast %10 : vector<8x1024xbf16> to vector<1x8x1024xbf16>
    tpu.vector_store %arg4[%c0_7, %c0_8, %c0_9], %13 {strides = array<i32>} : memref<1x8x1024xbf16, #tpu.memory_space<vmem>>, vector<1x8x1024xbf16>,
    return
  }
  func.func @transform_0(%arg0: i32) -> (i32, i32, i32) {
    %c0_i32 = arith.constant 0 : i32
    %c0_i32_0 = arith.constant 0 : i32
    %c0_i32_1 = arith.constant 0 : i32
    return %arg0, %c0_i32, %c0_i32_0 : i32, i32, i32
  }
  func.func @transform_1(%arg0: i32) -> (i32, i32) {
    %c0_i32 = arith.constant 0 : i32
    %c0_i32_0 = arith.constant 0 : i32
    %c0_i32_1 = arith.constant 0 : i32
    return %c0_i32, %c0_i32_0 : i32, i32
  }
  func.func @transform_2(%arg0: i32) -> (i32, i32) {
    %c0_i32 = arith.constant 0 : i32
    %c0_i32_0 = arith.constant 0 : i32
    %c0_i32_1 = arith.constant 0 : i32
    return %c0_i32, %c0_i32_0 : i32, i32
  }
  func.func @transform_3(%arg0: i32) -> (i32, i32, i32) {
    %c0_i32 = arith.constant 0 : i32
    %c0_i32_0 = arith.constant 0 : i32
    %c0_i32_1 = arith.constant 0 : i32
    return %arg0, %c0_i32, %c0_i32_0 : i32, i32, i32
  }
}

module attributes {stable_mosaic.version = 11 : i64} {
  func.func @_conv_instnorm_lrelu_kernel(%arg0: i32, %arg1: memref<2x128x256xbf16, #tpu.memory_space<vmem>>, %arg2: memref<16x128xbf16, #tpu.memory_space<vmem>>, %arg3: memref<16x1xf32, #tpu.memory_space<vmem>>, %arg4: memref<16x1xf32, #tpu.memory_space<vmem>>, %arg5: memref<2x16x256xbf16, #tpu.memory_space<vmem>>) attributes {dimension_semantics = [#tpu.dimension_semantics<parallel>], iteration_bounds = array<i64: 1>, scalar_prefetch = 0 : i64, scratch_operands = 0 : i64, tpu.core_type = #tpu.core_type<tc>, window_params = [{transform_indices = @transform_0, window_bounds = array<i64: 2, 128, 256>}, {pipeline_mode = #tpu.pipeline_mode<synchronous>, transform_indices = @transform_1, window_bounds = array<i64: 16, 128>}, {pipeline_mode = #tpu.pipeline_mode<synchronous>, transform_indices = @transform_2, window_bounds = array<i64: 16, 1>}, {pipeline_mode = #tpu.pipeline_mode<synchronous>, transform_indices = @transform_3, window_bounds = array<i64: 16, 1>}, {transform_indices = @transform_4, window_bounds = array<i64: 2, 16, 256>}]} {
    %c0 = arith.constant 0 : index
    %c0_0 = arith.constant 0 : index
    %0 = vector.load %arg2[%c0, %c0_0] : memref<16x128xbf16, #tpu.memory_space<vmem>>, vector<16x128xbf16>
    %c0_1 = arith.constant 0 : index
    %c0_2 = arith.constant 0 : index
    %1 = vector.load %arg3[%c0_1, %c0_2] : memref<16x1xf32, #tpu.memory_space<vmem>>, vector<16x1xf32>
    %c0_3 = arith.constant 0 : index
    %c0_4 = arith.constant 0 : index
    %2 = vector.load %arg4[%c0_3, %c0_4] : memref<16x1xf32, #tpu.memory_space<vmem>>, vector<16x1xf32>
    %c0_5 = arith.constant 0 : index
    %c0_6 = arith.constant 0 : index
    %c0_7 = arith.constant 0 : index
    %3 = vector.load %arg1[%c0_5, %c0_6, %c0_7] : memref<2x128x256xbf16, #tpu.memory_space<vmem>>, vector<1x128x256xbf16>
    %4 = vector.shape_cast %3 : vector<1x128x256xbf16> to vector<128x256xbf16>
    %cst = arith.constant dense<0.000000e+00> : vector<16x256xf32>
    %5 = tpu.matmul %0, %4, %cst {dimension_numbers = #tpu.dot_dimension_numbers<[1], [0], [0], [1], [0, 0, 1, 1], [], []>} : vector<16x128xbf16>, vector<128x256xbf16>, vector<16x256xf32> -> vector<16x256xf32>
    %cst_8 = arith.constant dense<0.000000e+00> : vector<16xf32>
    %6 = vector.multi_reduction <add>, %5, %cst_8 [1] : vector<16x256xf32> to vector<16xf32>
    %7 = vector.shape_cast %6 : vector<16xf32> to vector<16x1xf32>
    %cst_9 = arith.constant 2.560000e+02 : f32
    %8 = vector.broadcast %cst_9 : f32 to vector<16x1xf32>
    %9 = arith.divf %7, %8 : vector<16x1xf32>
    %10 = arith.mulf %5, %5 : vector<16x256xf32>
    %cst_10 = arith.constant dense<0.000000e+00> : vector<16xf32>
    %11 = vector.multi_reduction <add>, %10, %cst_10 [1] : vector<16x256xf32> to vector<16xf32>
    %12 = vector.shape_cast %11 : vector<16xf32> to vector<16x1xf32>
    %cst_11 = arith.constant 2.560000e+02 : f32
    %13 = vector.broadcast %cst_11 : f32 to vector<16x1xf32>
    %14 = arith.divf %12, %13 : vector<16x1xf32>
    %15 = arith.mulf %9, %9 : vector<16x1xf32>
    %16 = arith.subf %14, %15 : vector<16x1xf32>
    %cst_12 = arith.constant 9.99999974E-6 : f32
    %17 = vector.broadcast %cst_12 : f32 to vector<16x1xf32>
    %18 = arith.addf %16, %17 : vector<16x1xf32>
    %19 = math.rsqrt %18 : vector<16x1xf32>
    %20 = vector.broadcast %9 : vector<16x1xf32> to vector<16x256xf32>
    %21 = arith.subf %5, %20 : vector<16x256xf32>
    %22 = vector.broadcast %19 : vector<16x1xf32> to vector<16x256xf32>
    %23 = arith.mulf %21, %22 : vector<16x256xf32>
    %24 = vector.broadcast %1 : vector<16x1xf32> to vector<16x256xf32>
    %25 = arith.mulf %23, %24 : vector<16x256xf32>
    %26 = vector.broadcast %2 : vector<16x1xf32> to vector<16x256xf32>
    %27 = arith.addf %25, %26 : vector<16x256xf32>
    %cst_13 = arith.constant 2.000000e-01 : f32
    %28 = vector.broadcast %cst_13 : f32 to vector<16x256xf32>
    %29 = arith.mulf %28, %27 : vector<16x256xf32>
    %30 = arith.maximumf %27, %29 : vector<16x256xf32>
    %31 = arith.truncf %30 : vector<16x256xf32> to vector<16x256xbf16>
    %c0_14 = arith.constant 0 : index
    %c0_15 = arith.constant 0 : index
    %c0_16 = arith.constant 0 : index
    %32 = vector.load %arg5[%c0_14, %c0_15, %c0_16] : memref<2x16x256xbf16, #tpu.memory_space<vmem>>, vector<1x16x256xbf16>
    %33 = vector.shape_cast %32 : vector<1x16x256xbf16> to vector<16x256xbf16>
    %34 = vector.shape_cast %31 : vector<16x256xbf16> to vector<1x16x256xbf16>
    tpu.vector_store %arg5[%c0_14, %c0_15, %c0_16], %34 {strides = array<i32>} : memref<2x16x256xbf16, #tpu.memory_space<vmem>>, vector<1x16x256xbf16>,
    %c1 = arith.constant 1 : index
    %c0_17 = arith.constant 0 : index
    %c0_18 = arith.constant 0 : index
    %35 = vector.load %arg1[%c1, %c0_17, %c0_18] : memref<2x128x256xbf16, #tpu.memory_space<vmem>>, vector<1x128x256xbf16>
    %36 = vector.shape_cast %35 : vector<1x128x256xbf16> to vector<128x256xbf16>
    %cst_19 = arith.constant dense<0.000000e+00> : vector<16x256xf32>
    %37 = tpu.matmul %0, %36, %cst_19 {dimension_numbers = #tpu.dot_dimension_numbers<[1], [0], [0], [1], [0, 0, 1, 1], [], []>} : vector<16x128xbf16>, vector<128x256xbf16>, vector<16x256xf32> -> vector<16x256xf32>
    %cst_20 = arith.constant dense<0.000000e+00> : vector<16xf32>
    %38 = vector.multi_reduction <add>, %37, %cst_20 [1] : vector<16x256xf32> to vector<16xf32>
    %39 = vector.shape_cast %38 : vector<16xf32> to vector<16x1xf32>
    %cst_21 = arith.constant 2.560000e+02 : f32
    %40 = vector.broadcast %cst_21 : f32 to vector<16x1xf32>
    %41 = arith.divf %39, %40 : vector<16x1xf32>
    %42 = arith.mulf %37, %37 : vector<16x256xf32>
    %cst_22 = arith.constant dense<0.000000e+00> : vector<16xf32>
    %43 = vector.multi_reduction <add>, %42, %cst_22 [1] : vector<16x256xf32> to vector<16xf32>
    %44 = vector.shape_cast %43 : vector<16xf32> to vector<16x1xf32>
    %cst_23 = arith.constant 2.560000e+02 : f32
    %45 = vector.broadcast %cst_23 : f32 to vector<16x1xf32>
    %46 = arith.divf %44, %45 : vector<16x1xf32>
    %47 = arith.mulf %41, %41 : vector<16x1xf32>
    %48 = arith.subf %46, %47 : vector<16x1xf32>
    %cst_24 = arith.constant 9.99999974E-6 : f32
    %49 = vector.broadcast %cst_24 : f32 to vector<16x1xf32>
    %50 = arith.addf %48, %49 : vector<16x1xf32>
    %51 = math.rsqrt %50 : vector<16x1xf32>
    %52 = vector.broadcast %41 : vector<16x1xf32> to vector<16x256xf32>
    %53 = arith.subf %37, %52 : vector<16x256xf32>
    %54 = vector.broadcast %51 : vector<16x1xf32> to vector<16x256xf32>
    %55 = arith.mulf %53, %54 : vector<16x256xf32>
    %56 = vector.broadcast %1 : vector<16x1xf32> to vector<16x256xf32>
    %57 = arith.mulf %55, %56 : vector<16x256xf32>
    %58 = vector.broadcast %2 : vector<16x1xf32> to vector<16x256xf32>
    %59 = arith.addf %57, %58 : vector<16x256xf32>
    %cst_25 = arith.constant 2.000000e-01 : f32
    %60 = vector.broadcast %cst_25 : f32 to vector<16x256xf32>
    %61 = arith.mulf %60, %59 : vector<16x256xf32>
    %62 = arith.maximumf %59, %61 : vector<16x256xf32>
    %63 = arith.truncf %62 : vector<16x256xf32> to vector<16x256xbf16>
    %c1_26 = arith.constant 1 : index
    %c0_27 = arith.constant 0 : index
    %c0_28 = arith.constant 0 : index
    %64 = vector.load %arg5[%c1_26, %c0_27, %c0_28] : memref<2x16x256xbf16, #tpu.memory_space<vmem>>, vector<1x16x256xbf16>
    %65 = vector.shape_cast %64 : vector<1x16x256xbf16> to vector<16x256xbf16>
    %66 = vector.shape_cast %63 : vector<16x256xbf16> to vector<1x16x256xbf16>
    tpu.vector_store %arg5[%c1_26, %c0_27, %c0_28], %66 {strides = array<i32>} : memref<2x16x256xbf16, #tpu.memory_space<vmem>>, vector<1x16x256xbf16>,
    return
  }
  func.func @transform_0(%arg0: i32) -> (i32, i32, i32) {
    %c0_i32 = arith.constant 0 : i32
    %c0_i32_0 = arith.constant 0 : i32
    %c0_i32_1 = arith.constant 0 : i32
    return %arg0, %c0_i32, %c0_i32_0 : i32, i32, i32
  }
  func.func @transform_1(%arg0: i32) -> (i32, i32) {
    %c0_i32 = arith.constant 0 : i32
    %c0_i32_0 = arith.constant 0 : i32
    %c0_i32_1 = arith.constant 0 : i32
    return %c0_i32, %c0_i32_0 : i32, i32
  }
  func.func @transform_2(%arg0: i32) -> (i32, i32) {
    %c0_i32 = arith.constant 0 : i32
    %c0_i32_0 = arith.constant 0 : i32
    %c0_i32_1 = arith.constant 0 : i32
    return %c0_i32, %c0_i32_0 : i32, i32
  }
  func.func @transform_3(%arg0: i32) -> (i32, i32) {
    %c0_i32 = arith.constant 0 : i32
    %c0_i32_0 = arith.constant 0 : i32
    %c0_i32_1 = arith.constant 0 : i32
    return %c0_i32, %c0_i32_0 : i32, i32
  }
  func.func @transform_4(%arg0: i32) -> (i32, i32, i32) {
    %c0_i32 = arith.constant 0 : i32
    %c0_i32_0 = arith.constant 0 : i32
    %c0_i32_1 = arith.constant 0 : i32
    return %arg0, %c0_i32, %c0_i32_0 : i32, i32, i32
  }
}

module attributes {stable_mosaic.version = 11 : i64} {
  func.func @_conv_instnorm_lrelu_kernel(%arg0: i32, %arg1: memref<2x256x64xbf16, #tpu.memory_space<vmem>>, %arg2: memref<32x256xbf16, #tpu.memory_space<vmem>>, %arg3: memref<32x1xf32, #tpu.memory_space<vmem>>, %arg4: memref<32x1xf32, #tpu.memory_space<vmem>>, %arg5: memref<2x32x64xbf16, #tpu.memory_space<vmem>>) attributes {dimension_semantics = [#tpu.dimension_semantics<parallel>], iteration_bounds = array<i64: 1>, scalar_prefetch = 0 : i64, scratch_operands = 0 : i64, tpu.core_type = #tpu.core_type<tc>, window_params = [{transform_indices = @transform_0, window_bounds = array<i64: 2, 256, 64>}, {pipeline_mode = #tpu.pipeline_mode<synchronous>, transform_indices = @transform_1, window_bounds = array<i64: 32, 256>}, {pipeline_mode = #tpu.pipeline_mode<synchronous>, transform_indices = @transform_2, window_bounds = array<i64: 32, 1>}, {pipeline_mode = #tpu.pipeline_mode<synchronous>, transform_indices = @transform_3, window_bounds = array<i64: 32, 1>}, {transform_indices = @transform_4, window_bounds = array<i64: 2, 32, 64>}]} {
    %c0 = arith.constant 0 : index
    %c0_0 = arith.constant 0 : index
    %0 = vector.load %arg2[%c0, %c0_0] : memref<32x256xbf16, #tpu.memory_space<vmem>>, vector<32x256xbf16>
    %c0_1 = arith.constant 0 : index
    %c0_2 = arith.constant 0 : index
    %1 = vector.load %arg3[%c0_1, %c0_2] : memref<32x1xf32, #tpu.memory_space<vmem>>, vector<32x1xf32>
    %c0_3 = arith.constant 0 : index
    %c0_4 = arith.constant 0 : index
    %2 = vector.load %arg4[%c0_3, %c0_4] : memref<32x1xf32, #tpu.memory_space<vmem>>, vector<32x1xf32>
    %c0_5 = arith.constant 0 : index
    %c0_6 = arith.constant 0 : index
    %c0_7 = arith.constant 0 : index
    %3 = vector.load %arg1[%c0_5, %c0_6, %c0_7] : memref<2x256x64xbf16, #tpu.memory_space<vmem>>, vector<1x256x64xbf16>
    %4 = vector.shape_cast %3 : vector<1x256x64xbf16> to vector<256x64xbf16>
    %cst = arith.constant dense<0.000000e+00> : vector<32x64xf32>
    %5 = tpu.matmul %0, %4, %cst {dimension_numbers = #tpu.dot_dimension_numbers<[1], [0], [0], [1], [0, 0, 1, 1], [], []>} : vector<32x256xbf16>, vector<256x64xbf16>, vector<32x64xf32> -> vector<32x64xf32>
    %cst_8 = arith.constant dense<0.000000e+00> : vector<32xf32>
    %6 = vector.multi_reduction <add>, %5, %cst_8 [1] : vector<32x64xf32> to vector<32xf32>
    %7 = vector.shape_cast %6 : vector<32xf32> to vector<32x1xf32>
    %cst_9 = arith.constant 6.400000e+01 : f32
    %8 = vector.broadcast %cst_9 : f32 to vector<32x1xf32>
    %9 = arith.divf %7, %8 : vector<32x1xf32>
    %10 = arith.mulf %5, %5 : vector<32x64xf32>
    %cst_10 = arith.constant dense<0.000000e+00> : vector<32xf32>
    %11 = vector.multi_reduction <add>, %10, %cst_10 [1] : vector<32x64xf32> to vector<32xf32>
    %12 = vector.shape_cast %11 : vector<32xf32> to vector<32x1xf32>
    %cst_11 = arith.constant 6.400000e+01 : f32
    %13 = vector.broadcast %cst_11 : f32 to vector<32x1xf32>
    %14 = arith.divf %12, %13 : vector<32x1xf32>
    %15 = arith.mulf %9, %9 : vector<32x1xf32>
    %16 = arith.subf %14, %15 : vector<32x1xf32>
    %cst_12 = arith.constant 9.99999974E-6 : f32
    %17 = vector.broadcast %cst_12 : f32 to vector<32x1xf32>
    %18 = arith.addf %16, %17 : vector<32x1xf32>
    %19 = math.rsqrt %18 : vector<32x1xf32>
    %20 = vector.broadcast %9 : vector<32x1xf32> to vector<32x64xf32>
    %21 = arith.subf %5, %20 : vector<32x64xf32>
    %22 = vector.broadcast %19 : vector<32x1xf32> to vector<32x64xf32>
    %23 = arith.mulf %21, %22 : vector<32x64xf32>
    %24 = vector.broadcast %1 : vector<32x1xf32> to vector<32x64xf32>
    %25 = arith.mulf %23, %24 : vector<32x64xf32>
    %26 = vector.broadcast %2 : vector<32x1xf32> to vector<32x64xf32>
    %27 = arith.addf %25, %26 : vector<32x64xf32>
    %cst_13 = arith.constant 2.000000e-01 : f32
    %28 = vector.broadcast %cst_13 : f32 to vector<32x64xf32>
    %29 = arith.mulf %28, %27 : vector<32x64xf32>
    %30 = arith.maximumf %27, %29 : vector<32x64xf32>
    %31 = arith.truncf %30 : vector<32x64xf32> to vector<32x64xbf16>
    %c0_14 = arith.constant 0 : index
    %c0_15 = arith.constant 0 : index
    %c0_16 = arith.constant 0 : index
    %32 = vector.load %arg5[%c0_14, %c0_15, %c0_16] : memref<2x32x64xbf16, #tpu.memory_space<vmem>>, vector<1x32x64xbf16>
    %33 = vector.shape_cast %32 : vector<1x32x64xbf16> to vector<32x64xbf16>
    %34 = vector.shape_cast %31 : vector<32x64xbf16> to vector<1x32x64xbf16>
    tpu.vector_store %arg5[%c0_14, %c0_15, %c0_16], %34 {strides = array<i32>} : memref<2x32x64xbf16, #tpu.memory_space<vmem>>, vector<1x32x64xbf16>,
    %c1 = arith.constant 1 : index
    %c0_17 = arith.constant 0 : index
    %c0_18 = arith.constant 0 : index
    %35 = vector.load %arg1[%c1, %c0_17, %c0_18] : memref<2x256x64xbf16, #tpu.memory_space<vmem>>, vector<1x256x64xbf16>
    %36 = vector.shape_cast %35 : vector<1x256x64xbf16> to vector<256x64xbf16>
    %cst_19 = arith.constant dense<0.000000e+00> : vector<32x64xf32>
    %37 = tpu.matmul %0, %36, %cst_19 {dimension_numbers = #tpu.dot_dimension_numbers<[1], [0], [0], [1], [0, 0, 1, 1], [], []>} : vector<32x256xbf16>, vector<256x64xbf16>, vector<32x64xf32> -> vector<32x64xf32>
    %cst_20 = arith.constant dense<0.000000e+00> : vector<32xf32>
    %38 = vector.multi_reduction <add>, %37, %cst_20 [1] : vector<32x64xf32> to vector<32xf32>
    %39 = vector.shape_cast %38 : vector<32xf32> to vector<32x1xf32>
    %cst_21 = arith.constant 6.400000e+01 : f32
    %40 = vector.broadcast %cst_21 : f32 to vector<32x1xf32>
    %41 = arith.divf %39, %40 : vector<32x1xf32>
    %42 = arith.mulf %37, %37 : vector<32x64xf32>
    %cst_22 = arith.constant dense<0.000000e+00> : vector<32xf32>
    %43 = vector.multi_reduction <add>, %42, %cst_22 [1] : vector<32x64xf32> to vector<32xf32>
    %44 = vector.shape_cast %43 : vector<32xf32> to vector<32x1xf32>
    %cst_23 = arith.constant 6.400000e+01 : f32
    %45 = vector.broadcast %cst_23 : f32 to vector<32x1xf32>
    %46 = arith.divf %44, %45 : vector<32x1xf32>
    %47 = arith.mulf %41, %41 : vector<32x1xf32>
    %48 = arith.subf %46, %47 : vector<32x1xf32>
    %cst_24 = arith.constant 9.99999974E-6 : f32
    %49 = vector.broadcast %cst_24 : f32 to vector<32x1xf32>
    %50 = arith.addf %48, %49 : vector<32x1xf32>
    %51 = math.rsqrt %50 : vector<32x1xf32>
    %52 = vector.broadcast %41 : vector<32x1xf32> to vector<32x64xf32>
    %53 = arith.subf %37, %52 : vector<32x64xf32>
    %54 = vector.broadcast %51 : vector<32x1xf32> to vector<32x64xf32>
    %55 = arith.mulf %53, %54 : vector<32x64xf32>
    %56 = vector.broadcast %1 : vector<32x1xf32> to vector<32x64xf32>
    %57 = arith.mulf %55, %56 : vector<32x64xf32>
    %58 = vector.broadcast %2 : vector<32x1xf32> to vector<32x64xf32>
    %59 = arith.addf %57, %58 : vector<32x64xf32>
    %cst_25 = arith.constant 2.000000e-01 : f32
    %60 = vector.broadcast %cst_25 : f32 to vector<32x64xf32>
    %61 = arith.mulf %60, %59 : vector<32x64xf32>
    %62 = arith.maximumf %59, %61 : vector<32x64xf32>
    %63 = arith.truncf %62 : vector<32x64xf32> to vector<32x64xbf16>
    %c1_26 = arith.constant 1 : index
    %c0_27 = arith.constant 0 : index
    %c0_28 = arith.constant 0 : index
    %64 = vector.load %arg5[%c1_26, %c0_27, %c0_28] : memref<2x32x64xbf16, #tpu.memory_space<vmem>>, vector<1x32x64xbf16>
    %65 = vector.shape_cast %64 : vector<1x32x64xbf16> to vector<32x64xbf16>
    %66 = vector.shape_cast %63 : vector<32x64xbf16> to vector<1x32x64xbf16>
    tpu.vector_store %arg5[%c1_26, %c0_27, %c0_28], %66 {strides = array<i32>} : memref<2x32x64xbf16, #tpu.memory_space<vmem>>, vector<1x32x64xbf16>,
    return
  }
  func.func @transform_0(%arg0: i32) -> (i32, i32, i32) {
    %c0_i32 = arith.constant 0 : i32
    %c0_i32_0 = arith.constant 0 : i32
    %c0_i32_1 = arith.constant 0 : i32
    return %arg0, %c0_i32, %c0_i32_0 : i32, i32, i32
  }
  func.func @transform_1(%arg0: i32) -> (i32, i32) {
    %c0_i32 = arith.constant 0 : i32
    %c0_i32_0 = arith.constant 0 : i32
    %c0_i32_1 = arith.constant 0 : i32
    return %c0_i32, %c0_i32_0 : i32, i32
  }
  func.func @transform_2(%arg0: i32) -> (i32, i32) {
    %c0_i32 = arith.constant 0 : i32
    %c0_i32_0 = arith.constant 0 : i32
    %c0_i32_1 = arith.constant 0 : i32
    return %c0_i32, %c0_i32_0 : i32, i32
  }
  func.func @transform_3(%arg0: i32) -> (i32, i32) {
    %c0_i32 = arith.constant 0 : i32
    %c0_i32_0 = arith.constant 0 : i32
    %c0_i32_1 = arith.constant 0 : i32
    return %c0_i32, %c0_i32_0 : i32, i32
  }
  func.func @transform_4(%arg0: i32) -> (i32, i32, i32) {
    %c0_i32 = arith.constant 0 : i32
    %c0_i32_0 = arith.constant 0 : i32
    %c0_i32_1 = arith.constant 0 : i32
    return %arg0, %c0_i32, %c0_i32_0 : i32, i32, i32
  }
}

module attributes {stable_mosaic.version = 11 : i64} {
  func.func @_conv_instnorm_lrelu_head_kernel(%arg0: i32, %arg1: memref<2x512x16xbf16, #tpu.memory_space<vmem>>, %arg2: memref<64x512xbf16, #tpu.memory_space<vmem>>, %arg3: memref<64x1xf32, #tpu.memory_space<vmem>>, %arg4: memref<64x1xf32, #tpu.memory_space<vmem>>, %arg5: memref<64x16xf32, #tpu.memory_space<vmem>>, %arg6: memref<1x1xf32, #tpu.memory_space<vmem>>, %arg7: memref<2x1xf32, #tpu.memory_space<vmem>>) attributes {dimension_semantics = [#tpu.dimension_semantics<arbitrary>], iteration_bounds = array<i64: 1>, scalar_prefetch = 0 : i64, scratch_operands = 0 : i64, tpu.core_type = #tpu.core_type<tc>, window_params = [{pipeline_mode = #tpu.pipeline_mode<synchronous>, transform_indices = @transform_0, window_bounds = array<i64: 2, 512, 16>}, {pipeline_mode = #tpu.pipeline_mode<synchronous>, transform_indices = @transform_1, window_bounds = array<i64: 64, 512>}, {pipeline_mode = #tpu.pipeline_mode<synchronous>, transform_indices = @transform_2, window_bounds = array<i64: 64, 1>}, {pipeline_mode = #tpu.pipeline_mode<synchronous>, transform_indices = @transform_3, window_bounds = array<i64: 64, 1>}, {pipeline_mode = #tpu.pipeline_mode<synchronous>, transform_indices = @transform_4, window_bounds = array<i64: 64, 16>}, {pipeline_mode = #tpu.pipeline_mode<synchronous>, transform_indices = @transform_5, window_bounds = array<i64: 1, 1>}, {pipeline_mode = #tpu.pipeline_mode<synchronous>, transform_indices = @transform_6, window_bounds = array<i64: 2, 1>}]} {
    %c0 = arith.constant 0 : index
    %c0_0 = arith.constant 0 : index
    %0 = vector.load %arg2[%c0, %c0_0] : memref<64x512xbf16, #tpu.memory_space<vmem>>, vector<64x512xbf16>
    %c0_1 = arith.constant 0 : index
    %c0_2 = arith.constant 0 : index
    %1 = vector.load %arg3[%c0_1, %c0_2] : memref<64x1xf32, #tpu.memory_space<vmem>>, vector<64x1xf32>
    %c0_3 = arith.constant 0 : index
    %c0_4 = arith.constant 0 : index
    %2 = vector.load %arg4[%c0_3, %c0_4] : memref<64x1xf32, #tpu.memory_space<vmem>>, vector<64x1xf32>
    %c0_5 = arith.constant 0 : index
    %c0_6 = arith.constant 0 : index
    %3 = vector.load %arg5[%c0_5, %c0_6] : memref<64x16xf32, #tpu.memory_space<vmem>>, vector<64x16xf32>
    %c0_7 = arith.constant 0 : index
    %c0_8 = arith.constant 0 : index
    %c0_9 = arith.constant 0 : index
    %4 = vector.load %arg1[%c0_7, %c0_8, %c0_9] : memref<2x512x16xbf16, #tpu.memory_space<vmem>>, vector<1x512x16xbf16>
    %5 = vector.shape_cast %4 : vector<1x512x16xbf16> to vector<512x16xbf16>
    %cst = arith.constant dense<0.000000e+00> : vector<64x16xf32>
    %6 = tpu.matmul %0, %5, %cst {dimension_numbers = #tpu.dot_dimension_numbers<[1], [0], [0], [1], [0, 0, 1, 1], [], []>} : vector<64x512xbf16>, vector<512x16xbf16>, vector<64x16xf32> -> vector<64x16xf32>
    %cst_10 = arith.constant dense<0.000000e+00> : vector<64xf32>
    %7 = vector.multi_reduction <add>, %6, %cst_10 [1] : vector<64x16xf32> to vector<64xf32>
    %8 = vector.shape_cast %7 : vector<64xf32> to vector<64x1xf32>
    %cst_11 = arith.constant 1.600000e+01 : f32
    %9 = vector.broadcast %cst_11 : f32 to vector<64x1xf32>
    %10 = arith.divf %8, %9 : vector<64x1xf32>
    %11 = arith.mulf %6, %6 : vector<64x16xf32>
    %cst_12 = arith.constant dense<0.000000e+00> : vector<64xf32>
    %12 = vector.multi_reduction <add>, %11, %cst_12 [1] : vector<64x16xf32> to vector<64xf32>
    %13 = vector.shape_cast %12 : vector<64xf32> to vector<64x1xf32>
    %cst_13 = arith.constant 1.600000e+01 : f32
    %14 = vector.broadcast %cst_13 : f32 to vector<64x1xf32>
    %15 = arith.divf %13, %14 : vector<64x1xf32>
    %16 = arith.mulf %10, %10 : vector<64x1xf32>
    %17 = arith.subf %15, %16 : vector<64x1xf32>
    %cst_14 = arith.constant 9.99999974E-6 : f32
    %18 = vector.broadcast %cst_14 : f32 to vector<64x1xf32>
    %19 = arith.addf %17, %18 : vector<64x1xf32>
    %20 = math.rsqrt %19 : vector<64x1xf32>
    %21 = vector.broadcast %10 : vector<64x1xf32> to vector<64x16xf32>
    %22 = arith.subf %6, %21 : vector<64x16xf32>
    %23 = vector.broadcast %20 : vector<64x1xf32> to vector<64x16xf32>
    %24 = arith.mulf %22, %23 : vector<64x16xf32>
    %25 = vector.broadcast %1 : vector<64x1xf32> to vector<64x16xf32>
    %26 = arith.mulf %24, %25 : vector<64x16xf32>
    %27 = vector.broadcast %2 : vector<64x1xf32> to vector<64x16xf32>
    %28 = arith.addf %26, %27 : vector<64x16xf32>
    %cst_15 = arith.constant 2.000000e-01 : f32
    %29 = vector.broadcast %cst_15 : f32 to vector<64x16xf32>
    %30 = arith.mulf %29, %28 : vector<64x16xf32>
    %31 = arith.maximumf %28, %30 : vector<64x16xf32>
    %32 = arith.truncf %31 : vector<64x16xf32> to vector<64x16xbf16>
    %33 = arith.extf %32 : vector<64x16xbf16> to vector<64x16xf32>
    %34 = arith.mulf %33, %3 : vector<64x16xf32>
    %cst_16 = arith.constant dense<0.000000e+00> : vector<64xf32>
    %35 = vector.multi_reduction <add>, %34, %cst_16 [1] : vector<64x16xf32> to vector<64xf32>
    %36 = vector.shape_cast %35 : vector<64xf32> to vector<64x1xf32>
    %cst_17 = arith.constant dense<0.000000e+00> : vector<1xf32>
    %37 = vector.multi_reduction <add>, %36, %cst_17 [0] : vector<64x1xf32> to vector<1xf32>
    %38 = vector.shape_cast %37 : vector<1xf32> to vector<1x1xf32>
    %c1 = arith.constant 1 : index
    %c0_18 = arith.constant 0 : index
    %c0_19 = arith.constant 0 : index
    %39 = vector.load %arg1[%c1, %c0_18, %c0_19] : memref<2x512x16xbf16, #tpu.memory_space<vmem>>, vector<1x512x16xbf16>
    %40 = vector.shape_cast %39 : vector<1x512x16xbf16> to vector<512x16xbf16>
    %cst_20 = arith.constant dense<0.000000e+00> : vector<64x16xf32>
    %41 = tpu.matmul %0, %40, %cst_20 {dimension_numbers = #tpu.dot_dimension_numbers<[1], [0], [0], [1], [0, 0, 1, 1], [], []>} : vector<64x512xbf16>, vector<512x16xbf16>, vector<64x16xf32> -> vector<64x16xf32>
    %cst_21 = arith.constant dense<0.000000e+00> : vector<64xf32>
    %42 = vector.multi_reduction <add>, %41, %cst_21 [1] : vector<64x16xf32> to vector<64xf32>
    %43 = vector.shape_cast %42 : vector<64xf32> to vector<64x1xf32>
    %cst_22 = arith.constant 1.600000e+01 : f32
    %44 = vector.broadcast %cst_22 : f32 to vector<64x1xf32>
    %45 = arith.divf %43, %44 : vector<64x1xf32>
    %46 = arith.mulf %41, %41 : vector<64x16xf32>
    %cst_23 = arith.constant dense<0.000000e+00> : vector<64xf32>
    %47 = vector.multi_reduction <add>, %46, %cst_23 [1] : vector<64x16xf32> to vector<64xf32>
    %48 = vector.shape_cast %47 : vector<64xf32> to vector<64x1xf32>
    %cst_24 = arith.constant 1.600000e+01 : f32
    %49 = vector.broadcast %cst_24 : f32 to vector<64x1xf32>
    %50 = arith.divf %48, %49 : vector<64x1xf32>
    %51 = arith.mulf %45, %45 : vector<64x1xf32>
    %52 = arith.subf %50, %51 : vector<64x1xf32>
    %cst_25 = arith.constant 9.99999974E-6 : f32
    %53 = vector.broadcast %cst_25 : f32 to vector<64x1xf32>
    %54 = arith.addf %52, %53 : vector<64x1xf32>
    %55 = math.rsqrt %54 : vector<64x1xf32>
    %56 = vector.broadcast %45 : vector<64x1xf32> to vector<64x16xf32>
    %57 = arith.subf %41, %56 : vector<64x16xf32>
    %58 = vector.broadcast %55 : vector<64x1xf32> to vector<64x16xf32>
    %59 = arith.mulf %57, %58 : vector<64x16xf32>
    %60 = vector.broadcast %1 : vector<64x1xf32> to vector<64x16xf32>
    %61 = arith.mulf %59, %60 : vector<64x16xf32>
    %62 = vector.broadcast %2 : vector<64x1xf32> to vector<64x16xf32>
    %63 = arith.addf %61, %62 : vector<64x16xf32>
    %cst_26 = arith.constant 2.000000e-01 : f32
    %64 = vector.broadcast %cst_26 : f32 to vector<64x16xf32>
    %65 = arith.mulf %64, %63 : vector<64x16xf32>
    %66 = arith.maximumf %63, %65 : vector<64x16xf32>
    %67 = arith.truncf %66 : vector<64x16xf32> to vector<64x16xbf16>
    %68 = arith.extf %67 : vector<64x16xbf16> to vector<64x16xf32>
    %69 = arith.mulf %68, %3 : vector<64x16xf32>
    %cst_27 = arith.constant dense<0.000000e+00> : vector<64xf32>
    %70 = vector.multi_reduction <add>, %69, %cst_27 [1] : vector<64x16xf32> to vector<64xf32>
    %71 = vector.shape_cast %70 : vector<64xf32> to vector<64x1xf32>
    %cst_28 = arith.constant dense<0.000000e+00> : vector<1xf32>
    %72 = vector.multi_reduction <add>, %71, %cst_28 [0] : vector<64x1xf32> to vector<1xf32>
    %73 = vector.shape_cast %72 : vector<1xf32> to vector<1x1xf32>
    %74 = tpu.concatenate %38, %73 in 0 : vector<1x1xf32>, vector<1x1xf32> -> vector<2x1xf32>
    %c0_29 = arith.constant 0 : index
    %c0_30 = arith.constant 0 : index
    %75 = vector.load %arg6[%c0_29, %c0_30] : memref<1x1xf32, #tpu.memory_space<vmem>>, vector<1x1xf32>
    %76 = vector.broadcast %75 : vector<1x1xf32> to vector<2x1xf32>
    %77 = arith.addf %74, %76 : vector<2x1xf32>
    %c0_31 = arith.constant 0 : index
    %c0_32 = arith.constant 0 : index
    %78 = vector.load %arg7[%c0_31, %c0_32] : memref<2x1xf32, #tpu.memory_space<vmem>>, vector<2x1xf32>
    tpu.vector_store %arg7[%c0_31, %c0_32], %77 {strides = array<i32>} : memref<2x1xf32, #tpu.memory_space<vmem>>, vector<2x1xf32>,
    return
  }
  func.func @transform_0(%arg0: i32) -> (i32, i32, i32) {
    %c0_i32 = arith.constant 0 : i32
    %c0_i32_0 = arith.constant 0 : i32
    %c0_i32_1 = arith.constant 0 : i32
    %c0_i32_2 = arith.constant 0 : i32
    return %c0_i32, %c0_i32_0, %c0_i32_1 : i32, i32, i32
  }
  func.func @transform_1(%arg0: i32) -> (i32, i32) {
    %c0_i32 = arith.constant 0 : i32
    %c0_i32_0 = arith.constant 0 : i32
    %c0_i32_1 = arith.constant 0 : i32
    return %c0_i32, %c0_i32_0 : i32, i32
  }
  func.func @transform_2(%arg0: i32) -> (i32, i32) {
    %c0_i32 = arith.constant 0 : i32
    %c0_i32_0 = arith.constant 0 : i32
    %c0_i32_1 = arith.constant 0 : i32
    return %c0_i32, %c0_i32_0 : i32, i32
  }
  func.func @transform_3(%arg0: i32) -> (i32, i32) {
    %c0_i32 = arith.constant 0 : i32
    %c0_i32_0 = arith.constant 0 : i32
    %c0_i32_1 = arith.constant 0 : i32
    return %c0_i32, %c0_i32_0 : i32, i32
  }
  func.func @transform_4(%arg0: i32) -> (i32, i32) {
    %c0_i32 = arith.constant 0 : i32
    %c0_i32_0 = arith.constant 0 : i32
    %c0_i32_1 = arith.constant 0 : i32
    return %c0_i32, %c0_i32_0 : i32, i32
  }
  func.func @transform_5(%arg0: i32) -> (i32, i32) {
    %c0_i32 = arith.constant 0 : i32
    %c0_i32_0 = arith.constant 0 : i32
    %c0_i32_1 = arith.constant 0 : i32
    return %c0_i32, %c0_i32_0 : i32, i32
  }
  func.func @transform_6(%arg0: i32) -> (i32, i32) {
    %c0_i32 = arith.constant 0 : i32
    %c0_i32_0 = arith.constant 0 : i32
    %c0_i32_1 = arith.constant 0 : i32
    return %c0_i32, %c0_i32_0 : i32, i32
  }
}

</mosaic_0001>

<bundles_post_ra>
// kernel: discriminator_forward.4
= control target key start
LH: loop header
LB: loop body
LE: loop exit
PB: predicated region body
PF: predicated region fallthrough
CT: control target
= control target key end

     0   :  { %s630_s12 = smov 0   ;;  %s679_s0 = inlined_call_operand.vmem [shape: bf16[2,32,1024], index: 0, kind: input, shape index: {}]   ;;  %s680_s1 = inlined_call_operand.vmem [shape: bf16[8,32], index: 1, kind: input, shape index: {}]   ;;  %s681_s2 = inlined_call_operand.vmem [shape: f32[8,1], index: 2, kind: input, shape index: {}]   ;;  %s682_s3 = inlined_call_operand.vmem [shape: bf16[2,8,1024], index: 3, kind: output, shape index: {}]  }
   0x1 LB: > { %s550_s13 = sadd.s32 4294967295, %s607_s12   ;;  %p554_p0 = scmp.ge.s32.totalorder %s607_s12, 1  ;;  %s607_s12 = sphi %s630_s12, %s13_s12  }
   0x2   : > { %p137_p1 = scmp.lt.s32.totalorder %s607_s12, 3 }
   0x4   : > { %p138_p2 = pnand %p554_p0, %p137_p1 }
   0x5   : > { %p161_p3 = scmp.lt.s32.totalorder (!%p138_p2), %s550_s13, 1  ;;  %v173_v0 = vld [vmem:[%s681_s2] sm:$0xff] (!%p138_p2)  ;;  %v609_v1 = vmov (!%p138_p2), 0   ;;  %vm275_vm0 = vcmask (!%p138_p2), 261120  }
   0x6   : > { %141 = sbr.rel (%p138_p2) target bundleno = 258 (0x102), region = 32  ;;  %311 = vmatprep.mubr.bf16.mxu0 (!%p138_p2), %v609_v1  ;;  %352 = vmatprep.mubr.bf16.mxu1 (!%p138_p2), %v609_v1  ;;  %v172_v28 = vld [vmem:[%s680_s1] sm:$0xf] (!%p138_p2) }
   0x7   : > { %600 = vset.pattern.permute.xlu0 (!%p138_p2), %v609_v1 }
   0x8   : > { %192 = vperm.xlu0 (!%p138_p2), %600, %v173_v0  }
   0xd   : > { %s684_s13 = smov (!%p161_p3, %s550_s13), 1 }
   0xe   : > { %s585_s16 = sshll.u32 %s684_s13, 7  ;;  %s586_s22 = sshll.u32 %s684_s13, 5 }
   0xf   : > { %s647_s19 = scalar_lea.vmem %s679_s0, %s585_s16  ;;  %s170_s25 = scalar_lea.vmem %s682_s3, %s586_s22 }
  0x10   : > { %v174_v2 = vld [vmem:[%s647_s19] sm:$0xff]  ;;  %v175_v4 = vld [vmem:[%s647_s19 + $0x8] sm:$0xff]  ;;  %v176_v15 = vld [vmem:[%s647_s19 + $0x10] sm:$0xff] }
  0x11   : > { %v178_v3 = vld [vmem:[%s647_s19 + $0x20] sm:$0xff]  ;;  %v179_v6 = vld [vmem:[%s647_s19 + $0x28] sm:$0xff]  ;;  %v180_v17 = vld [vmem:[%s647_s19 + $0x30] sm:$0xff] }
  0x12   : > { %v560_v5 = vcombine.high %v174_v2, %v178_v3  ;;  %v559_v7 = vcombine.low %v174_v2, %v178_v3  ;;  %v182_v8 = vld [vmem:[%s647_s19 + $0x40] sm:$0xff]  ;;  %v562_v10 = vcombine.high %v175_v4, %v179_v6  ;;  %v561_v11 = vcombine.low %v175_v4, %v179_v6  ;;  %v183_v13 = vld [vmem:[%s647_s19 + $0x48] sm:$0xff]  ;;  %v177_v18 = vld [vmem:[%s647_s19 + $0x18] sm:$0xff] }
  0x13   : > { %v186_v9 = vld [vmem:[%s647_s19 + $0x60] sm:$0xff]  ;;  %v187_v14 = vld [vmem:[%s647_s19 + $0x68] sm:$0xff]  ;;  %v181_v19 = vld [vmem:[%s647_s19 + $0x38] sm:$0xff]  ;;  %v564_v22 = vcombine.high %v176_v15, %v180_v17  ;;  %v563_v29 = vcombine.low %v176_v15, %v180_v17 }
  0x14   : > { %v568_v12 = vcombine.high %v182_v8, %v186_v9  ;;  %279 = vmatprep.subr.bf16.mxu0 %v560_v5  ;;  %v570_v16 = vcombine.high %v183_v13, %v187_v14  ;;  %320 = vmatprep.subr.bf16.mxu1 %v562_v10  ;;  %v567_v20 = vcombine.low %v182_v8, %v186_v9  ;;  %v184_v24 = vld [vmem:[%s647_s19 + $0x50] sm:$0xff]  ;;  %v185_v26 = vld [vmem:[%s647_s19 + $0x58] sm:$0xff] }
  0x15   : > { %280 = vmatpush1.bf16.msra.mxu0 %v559_v7  ;;  %321 = vmatpush1.bf16.msra.mxu1 %v561_v11  ;;  %v569_v21 = vcombine.low %v183_v13, %v187_v14  ;;  %v566_v23 = vcombine.high %v177_v18, %v181_v19  ;;  %v188_v25 = vld [vmem:[%s647_s19 + $0x70] sm:$0xff]  ;;  %v189_v27 = vld [vmem:[%s647_s19 + $0x78] sm:$0xff]  ;;  %v565_v30 = vcombine.low %v177_v18, %v181_v19 }
  0x16   : > { %281 = vmatprep.subr.bf16.mxu0 %v568_v12  ;;  %322 = vmatprep.subr.bf16.mxu1 %v570_v16  ;;  %v572_v31 = vcombine.high %v184_v24, %v188_v25  ;;  %v574_v32 = vcombine.high %v185_v26, %v189_v27  ;;  %v571_v33 = vcombine.low %v184_v24, %v188_v25 }
  0x17   : > { %v573_v34 = vcombine.low %v185_v26, %v189_v27 }
  0x19   : > { %282 = vmatpush1.bf16.msra.mxu0 %v567_v20  ;;  %323 = vmatpush1.bf16.msra.mxu1 %v569_v21 }
  0x1a   : > { %361 = vmatprep.subr.bf16.mxu0 %v564_v22  ;;  %402 = vmatprep.subr.bf16.mxu1 %v566_v23 }
  0x1c   : > { %575 = vmatmul.mubr.msk.bf16.vlgmr.msra.gmra.mrb[0].mxu0 %vm275_vm0, %v172_v28  ;;  %576 = vmatmul.mubr.msk.bf16.vlgmr.msra.gmra.mrb[0].mxu1 %vm275_vm0, %v172_v28 }
  0x1d   : > { %362 = vmatpush1.bf16.msra.mxu0 %v563_v29  ;;  %403 = vmatpush1.bf16.msra.mxu1 %v565_v30 }
  0x1e   : > { %363 = vmatprep.subr.bf16.mxu0 %v572_v31  ;;  %404 = vmatprep.subr.bf16.mxu1 %v574_v32 }
  0x1f   : > { %393 = vmatprep.mubr.bf16.mxu0 %v609_v1  ;;  %434 = vmatprep.mubr.bf16.mxu1 %v609_v1 }
  0x21   : > { %364 = vmatpush1.bf16.msra.mxu0 %v571_v33  ;;  %405 = vmatpush1.bf16.msra.mxu1 %v573_v34 }
  0x24   : > { %577 = vmatmul.mubr.msk.bf16.vlgmr.msra.gmra.mrb[4].mxu0 %vm275_vm0, %v172_v28  ;;  %578 = vmatmul.mubr.msk.bf16.vlgmr.msra.gmra.mrb[4].mxu1 %vm275_vm0, %v172_v28 }
  0x87   : > { %v193_v35 = vpop.permute.xlu0 %192 }
  0xef   : > { %v313_v36 = vpop.f32.mrb[0].mxu0  ;;  %v354_v38 = vpop.f32.mrb[0].mxu1 }
  0xf0   : > { %v314_v37 = vadd.f32 %v313_v36, %v193_v35  ;;  %v315_v39 = vpop.f32.mrb[1].mxu0  ;;  %v355_v40 = vadd.f32 %v354_v38, %v193_v35  ;;  %v356_v42 = vpop.f32.mrb[1].mxu1 }
  0xf1   : > { %v316_v41 = vadd.f32 %v315_v39, %v193_v35  ;;  %v317_v43 = vpop.f32.mrb[2].mxu0  ;;  %v357_v45 = vadd.f32 %v356_v42, %v193_v35  ;;  %v358_v46 = vpop.f32.mrb[2].mxu1 }
  0xf2   : > { %v443_v44 = vmul.f32 0.2, %v314_v37  ;;  %v318_v47 = vpop.f32.mrb[3].mxu0  ;;  %v445_v48 = vmul.f32 0.2, %v355_v40  ;;  %v359_v50 = vpop.f32.mrb[3].mxu1 }
  0xf3   : > { %v444_v49 = vmul.f32 0.2, %v316_v41  ;;  %v446_v52 = vmul.f32 0.2, %v357_v45 }
  0xf4   : > { %v451_v51 = vmax.f32 %v314_v37, %v443_v44  ;;  %v453_v53 = vmax.f32 %v355_v40, %v445_v48 }
  0xf5   : > { %v452_v54 = vmax.f32 %v316_v41, %v444_v49  ;;  %v454_v55 = vmax.f32 %v357_v45, %v446_v52 }
  0xf7   : > { %v587_v56 = vpack.c.bf16 %v452_v54, %v451_v51  ;;  %v395_v57 = vpop.f32.mrb[4].mxu0  ;;  %v588_v58 = vpack.c.bf16 %v454_v55, %v453_v53  ;;  %v436_v60 = vpop.f32.mrb[4].mxu1 }
  0xf8   : > { %v396_v59 = vadd.f32 %v395_v57, %v193_v35  ;;  %v397_v61 = vpop.f32.mrb[5].mxu0  ;;  %v437_v62 = vadd.f32 %v436_v60, %v193_v35  ;;  %v438_v0 = vpop.f32.mrb[5].mxu1 }
  0xf9   : > { %491 = vst [vmem:[%s170_s25] sm:$0xff] %v587_v56  ;;  %v398_v63 = vadd.f32 %v397_v61, %v193_v35  ;;  %v399_v1 = vpop.f32.mrb[6].mxu0  ;;  %492 = vst [vmem:[%s170_s25 + $0x8] sm:$0xff] %v588_v58  ;;  %v439_v3 = vadd.f32 %v438_v0, %v193_v35  ;;  %v440_v4 = vpop.f32.mrb[6].mxu1 }
  0xfa   : > { %v447_v2 = vmul.f32 0.2, %v396_v59  ;;  %v400_v5 = vpop.f32.mrb[7].mxu0  ;;  %v449_v6 = vmul.f32 0.2, %v437_v62  ;;  %v441_v8 = vpop.f32.mrb[7].mxu1 }
  0xfb   : > { %v448_v7 = vmul.f32 0.2, %v398_v63  ;;  %v450_v10 = vmul.f32 0.2, %v439_v3 }
  0xfc   : > { %v455_v9 = vmax.f32 %v396_v59, %v447_v2  ;;  %v457_v11 = vmax.f32 %v437_v62, %v449_v6 }
  0xfd   : > { %v456_v12 = vmax.f32 %v398_v63, %v448_v7  ;;  %v458_v13 = vmax.f32 %v439_v3, %v450_v10 }
  0xff   : > { %v589_v14 = vpack.c.bf16 %v456_v12, %v455_v9  ;;  %v590_v15 = vpack.c.bf16 %v458_v13, %v457_v11 }
 0x101   : > { %493 = vst [vmem:[%s170_s25 + $0x10] sm:$0xff] %v589_v14  ;;  %494 = vst [vmem:[%s170_s25 + $0x18] sm:$0xff] %v590_v15 }
 0x102 PF: > { %s13_s12 = sadd.s32 1, %s607_s12  }
 0x103   : > { %p10_p4 = scmp.ge.s32.totalorder %s13_s12, 4  }
 0x105   :  { %12 = sbr.rel (!%p10_p4) target bundleno = 1 (0x1), region = 62 }

// kernel: discriminator_forward.5
= control target key start
LH: loop header
LB: loop body
LE: loop exit
PB: predicated region body
PF: predicated region fallthrough
CT: control target
= control target key end

     0   :  { %v586_v1 = vmov 0   ;;  %s789_s0 = inlined_call_operand.vmem [shape: bf16[2,128,256], index: 0, kind: input, shape index: {}]   ;;  %s790_s1 = inlined_call_operand.vmem [shape: bf16[16,128], index: 1, kind: input, shape index: {}]   ;;  %s791_s2 = inlined_call_operand.vmem [shape: f32[16,1], index: 2, kind: input, shape index: {}]   ;;  %s792_s3 = inlined_call_operand.vmem [shape: f32[16,1], index: 3, kind: input, shape index: {}]   ;;  %s793_s4 = inlined_call_operand.vmem [shape: bf16[2,16,256], index: 4, kind: output, shape index: {}]  }
   0x1   :  { %v529_v0 = vld [vmem:[%s789_s0 + $0x4] ss:$8 sps:$4 sm:$0xff]   ;;  %158 = vmatprep.mubr.bf16.mxu0 %v586_v1  ;;  %385 = vmatprep.mubr.bf16.mxu1 %v586_v1  ;;  %v533_v3 = vld [vmem:[%s789_s0] ss:$8 sps:$4 sm:$0xff]   ;;  %v535_v5 = vld [vmem:[%s789_s0 + $0x14] ss:$8 sps:$4 sm:$0xff]  }
   0x2   :  { %v531_v2 = vld [vmem:[%s789_s0 + $0x84] ss:$8 sps:$4 sm:$0xff]   ;;  %528 = vset.pattern.permute.xlu1 %v586_v1  ;;  %527 = vset.pattern.permute.xlu0 %v586_v1  ;;  %v534_v4 = vld [vmem:[%s789_s0 + $0x80] ss:$8 sps:$4 sm:$0xff]   ;;  %v537_v6 = vld [vmem:[%s789_s0 + $0x94] ss:$8 sps:$4 sm:$0xff]  }
   0x3   :  { %126 = vmatprep.subr.bf16.mxu0 %v529_v0  ;;  %353 = vmatprep.subr.bf16.mxu1 %v531_v2  ;;  %v539_v7 = vld [vmem:[%s789_s0 + $0x10] ss:$8 sps:$4 sm:$0xff]   ;;  %v541_v9 = vld [vmem:[%s789_s0 + $0x24] ss:$8 sps:$4 sm:$0xff]   ;;  %v545_v11 = vld [vmem:[%s789_s0 + $0x20] ss:$8 sps:$4 sm:$0xff]  }
   0x4   :  { %127 = vmatpush1.bf16.msra.mxu0 %v533_v3  ;;  %354 = vmatpush1.bf16.msra.mxu1 %v534_v4  ;;  %v540_v8 = vld [vmem:[%s789_s0 + $0x90] ss:$8 sps:$4 sm:$0xff]   ;;  %v543_v10 = vld [vmem:[%s789_s0 + $0xa4] ss:$8 sps:$4 sm:$0xff]   ;;  %v546_v12 = vld [vmem:[%s789_s0 + $0xa0] ss:$8 sps:$4 sm:$0xff]  }
   0x5   :  { %128 = vmatprep.subr.bf16.mxu0 %v535_v5  ;;  %355 = vmatprep.subr.bf16.mxu1 %v537_v6  ;;  %v547_v13 = vld [vmem:[%s789_s0 + $0x34] ss:$8 sps:$4 sm:$0xff]   ;;  %v551_v15 = vld [vmem:[%s789_s0 + $0x30] ss:$8 sps:$4 sm:$0xff]   ;;  %v553_v17 = vld [vmem:[%s789_s0 + $0x44] ss:$8 sps:$4 sm:$0xff]  }
   0x6   :  { %v549_v14 = vld [vmem:[%s789_s0 + $0xb4] ss:$8 sps:$4 sm:$0xff]   ;;  %v552_v16 = vld [vmem:[%s789_s0 + $0xb0] ss:$8 sps:$4 sm:$0xff]   ;;  %v555_v18 = vld [vmem:[%s789_s0 + $0xc4] ss:$8 sps:$4 sm:$0xff]  }
   0x7   :  { %v557_v19 = vld [vmem:[%s789_s0 + $0x40] ss:$8 sps:$4 sm:$0xff]   ;;  %v559_v21 = vld [vmem:[%s789_s0 + $0x54] ss:$8 sps:$4 sm:$0xff]   ;;  %v563_v23 = vld [vmem:[%s789_s0 + $0x50] ss:$8 sps:$4 sm:$0xff]  }
   0x8   :  { %129 = vmatpush1.bf16.msra.mxu0 %v539_v7  ;;  %356 = vmatpush1.bf16.msra.mxu1 %v540_v8  ;;  %v558_v20 = vld [vmem:[%s789_s0 + $0xc0] ss:$8 sps:$4 sm:$0xff]   ;;  %v561_v22 = vld [vmem:[%s789_s0 + $0xd4] ss:$8 sps:$4 sm:$0xff]   ;;  %v564_v24 = vld [vmem:[%s789_s0 + $0xd0] ss:$8 sps:$4 sm:$0xff]  }
   0x9   :  { %130 = vmatprep.subr.bf16.mxu0 %v541_v9  ;;  %357 = vmatprep.subr.bf16.mxu1 %v543_v10  ;;  %v565_v25 = vld [vmem:[%s789_s0 + $0x64] ss:$8 sps:$4 sm:$0xff]   ;;  %v569_v27 = vld [vmem:[%s789_s0 + $0x60] ss:$8 sps:$4 sm:$0xff]   ;;  %v571_v29 = vld [vmem:[%s789_s0 + $0x74] ss:$8 sps:$4 sm:$0xff]  }
   0xa   :  { %v567_v26 = vld [vmem:[%s789_s0 + $0xe4] ss:$8 sps:$4 sm:$0xff]   ;;  %v570_v28 = vld [vmem:[%s789_s0 + $0xe0] ss:$8 sps:$4 sm:$0xff]   ;;  %v573_v30 = vld [vmem:[%s789_s0 + $0xf4] ss:$8 sps:$4 sm:$0xff]  }
   0xb   :  { %v575_v31 = vld [vmem:[%s789_s0 + $0x70] ss:$8 sps:$4 sm:$0xff]   ;;  %v577_v33 = vld [vmem:[%s790_s1] sm:$0xff]   ;;  %v21_v58 = vld [vmem:[%s791_s2 + $0x8] sm:$0xff] }
   0xc   :  { %131 = vmatpush1.bf16.msra.mxu0 %v545_v11  ;;  %358 = vmatpush1.bf16.msra.mxu1 %v546_v12  ;;  %v576_v32 = vld [vmem:[%s789_s0 + $0xf0] ss:$8 sps:$4 sm:$0xff]   ;;  %v22_v59 = vld [vmem:[%s792_s3] sm:$0xff]  ;;  %v23_v61 = vld [vmem:[%s792_s3 + $0x8] sm:$0xff] }
   0xd   :  { %132 = vmatprep.subr.bf16.mxu0 %v547_v13  ;;  %359 = vmatprep.subr.bf16.mxu1 %v549_v14  ;;  %v20_v60 = vld [vmem:[%s791_s2] sm:$0xff] }
  0x10   :  { %133 = vmatpush1.bf16.msra.mxu0 %v551_v15  ;;  %360 = vmatpush1.bf16.msra.mxu1 %v552_v16 }
  0x11   :  { %134 = vmatprep.subr.bf16.mxu0 %v553_v17  ;;  %361 = vmatprep.subr.bf16.mxu1 %v555_v18 }
  0x14   :  { %135 = vmatpush1.bf16.msra.mxu0 %v557_v19  ;;  %362 = vmatpush1.bf16.msra.mxu1 %v558_v20 }
  0x15   :  { %136 = vmatprep.subr.bf16.mxu0 %v559_v21  ;;  %363 = vmatprep.subr.bf16.mxu1 %v561_v22 }
  0x18   :  { %137 = vmatpush1.bf16.msra.mxu0 %v563_v23  ;;  %364 = vmatpush1.bf16.msra.mxu1 %v564_v24 }
  0x19   :  { %138 = vmatprep.subr.bf16.mxu0 %v565_v25  ;;  %365 = vmatprep.subr.bf16.mxu1 %v567_v26 }
  0x1c   :  { %139 = vmatpush1.bf16.msra.mxu0 %v569_v27  ;;  %366 = vmatpush1.bf16.msra.mxu1 %v570_v28 }
  0x1d   :  { %140 = vmatprep.subr.bf16.mxu0 %v571_v29  ;;  %367 = vmatprep.subr.bf16.mxu1 %v573_v30 }
  0x20   :  { %141 = vmatpush1.bf16.msra.mxu0 %v575_v31  ;;  %368 = vmatpush1.bf16.msra.mxu1 %v576_v32 }
  0x23   :  { %159 = vmatmul.mubr.bf16.vlgmr.msra.gmra.mrb[0].mxu0 %v577_v33  ;;  %386 = vmatmul.mubr.bf16.vlgmr.msra.gmra.mrb[0].mxu1 %v577_v33 }
  0xf6   :  { %v711_v34 = vpop.f32.mrb[0].mxu0  ;;  %v713_v35 = vpop.f32.mrb[0].mxu1 }
  0xf7   :  { %v715_v36 = vpop.f32.mrb[1].mxu0  ;;  %v717_v37 = vpop.f32.mrb[1].mxu1  ;;  %v178_v38 = vmul.f32 %v711_v34, %v711_v34  ;;  %v404_v39 = vmul.f32 %v713_v35, %v713_v35 }
  0xf8   :  { %v723_v40 = vpop.f32.mrb[2].mxu1  ;;  %v396_v41 = vadd.f32 %v717_v37, %v713_v35  ;;  %v169_v42 = vadd.f32 %v715_v36, %v711_v34  ;;  %v729_v43 = vpop.f32.mrb[2].mxu0  ;;  %v179_v44 = vmul.f32 %v715_v36, %v715_v36  ;;  %v405_v45 = vmul.f32 %v717_v37, %v717_v37 }
  0xf9   :  { %v735_v46 = vpop.f32.mrb[3].mxu1  ;;  %v737_v47 = vpop.f32.mrb[3].mxu0  ;;  %v180_v48 = vmul.f32 %v729_v43, %v729_v43  ;;  %v406_v49 = vmul.f32 %v723_v40, %v723_v40 }
  0xfa   :  { %v407_v50 = vmul.f32 %v735_v46, %v735_v46  ;;  %397 = vadd.xlane.f32.xlu1 %v396_v41  ;;  %170 = vadd.xlane.f32.xlu0 %v169_v42  ;;  %v181_v51 = vmul.f32 %v737_v47, %v737_v47  ;;  %v399_v52 = vadd.f32 %v735_v46, %v723_v40 }
  0xfb   :  { %v172_v53 = vadd.f32 %v737_v47, %v729_v43  ;;  %v182_v54 = vadd.f32 %v179_v44, %v178_v38  ;;  %v408_v55 = vadd.f32 %v405_v45, %v404_v39 }
  0xfc   :  { %v185_v56 = vadd.f32 %v181_v51, %v180_v48  ;;  %v411_v57 = vadd.f32 %v407_v50, %v406_v49 }
  0xfe   :  { %400 = vadd.xlane.f32.xlu1 %v399_v52  ;;  %173 = vadd.xlane.f32.xlu0 %v172_v53 }
 0x102   :  { %183 = vadd.xlane.f32.xlu0 %v182_v54 }
 0x106   :  { %409 = vadd.xlane.f32.xlu0 %v408_v55 }
 0x10f   :  { %213 = vperm.xlu1 %528, %v21_v58  }
 0x113   :  { %222 = vperm.xlu1 %528, %v22_v59  }
 0x11c   :  { %208 = vperm.xlu0 %527, %v20_v60  }
 0x137   :  { %186 = vadd.xlane.f32.xlu1 %v185_v56 }
 0x13b   :  { %412 = vadd.xlane.f32.xlu1 %v411_v57 }
 0x14c   :  { %227 = vperm.xlu1 %528, %v23_v61  }
 0x187   :  { %v171_v62 = vpop.xlane.xlu0 %170  ;;  %v398_v1 = vpop.xlane.xlu1 %397 }
 0x188   :  { %v176_v0 = vmul.f32 0.00390625, %v171_v62  ;;  %v402_v4 = vmul.f32 0.00390625, %v398_v1 }
 0x18a   :  { %v190_v2 = vmul.f32 %v176_v0, %v176_v0  ;;  %v416_v9 = vmul.f32 %v402_v4, %v402_v4  ;;  %v198_v15 = vsub.f32 %v711_v34, %v176_v0  ;;  %v199_v16 = vsub.f32 %v715_v36, %v176_v0 }
 0x18b   :  { %v174_v63 = vpop.xlane.xlu0 %173  ;;  %v401_v12 = vpop.xlane.xlu1 %400  ;;  %v424_v21 = vsub.f32 %v713_v35, %v402_v4  ;;  %v425_v22 = vsub.f32 %v717_v37, %v402_v4 }
 0x18c   :  { %v177_v49 = vmul.f32 0.00390625, %v174_v63  ;;  %v403_v51 = vmul.f32 0.00390625, %v401_v12 }
 0x18e   :  { %v191_v53 = vmul.f32 %v177_v49, %v177_v49  ;;  %v417_v57 = vmul.f32 %v403_v51, %v403_v51  ;;  %v200_v61 = vsub.f32 %v729_v43, %v177_v49  ;;  %v201_v62 = vsub.f32 %v737_v47, %v177_v49 }
 0x18f   :  { %v184_v3 = vpop.xlane.xlu0 %183  ;;  %v763_v14 = vpop.permute.xlu1 %213 }
 0x190   :  { %v188_v5 = vmul.f32 0.00390625, %v184_v3  ;;  %v427_v3 = vsub.f32 %v735_v46, %v403_v51 }
 0x192   :  { %v192_v6 = vsub.f32 %v188_v5, %v190_v2  ;;  %v426_v2 = vsub.f32 %v723_v40, %v403_v51 }
 0x193   :  { %v410_v7 = vpop.xlane.xlu0 %409  ;;  %v223_v26 = vpop.permute.xlu1 %222 }
 0x194   :  { %v194_v8 = vadd.f32 1e-05, %v192_v6  ;;  %v414_v10 = vmul.f32 0.00390625, %v410_v7 }
 0x196   :  { %578 = vrsqrt.f32 %v194_v8  ;;  %v418_v11 = vsub.f32 %v414_v10, %v416_v9 }
 0x198   :  { %v420_v13 = vadd.f32 1e-05, %v418_v11 }
 0x19a   :  { %580 = vrsqrt.f32 %v420_v13 }
 0x19b   :  { %v209_v18 = vpop.permute.xlu0 %208 }
 0x1a0   :  { %v579_v17 = vpop.eup %578 }
 0x1a1   :  { %v202_v19 = vmul.f32 %v579_v17, %v198_v15  ;;  %v203_v20 = vmul.f32 %v579_v17, %v199_v16 }
 0x1a3   :  { %v216_v23 = vmul.f32 %v209_v18, %v202_v19  ;;  %v217_v24 = vmul.f32 %v209_v18, %v203_v20 }
 0x1a4   :  { %v581_v25 = vpop.eup %580 }
 0x1a5   :  { %v428_v27 = vmul.f32 %v581_v25, %v424_v21  ;;  %v429_v28 = vmul.f32 %v581_v25, %v425_v22  ;;  %v230_v29 = vadd.f32 %v223_v26, %v216_v23  ;;  %v231_v30 = vadd.f32 %v223_v26, %v217_v24 }
 0x1a7   :  { %v234_v31 = vmul.f32 0.2, %v230_v29  ;;  %v235_v32 = vmul.f32 0.2, %v231_v30  ;;  %v432_v33 = vmul.f32 %v428_v27, %v209_v18  ;;  %v433_v34 = vmul.f32 %v429_v28, %v209_v18 }
 0x1a9   :  { %v238_v36 = vmax.f32 %v230_v29, %v234_v31  ;;  %v239_v38 = vmax.f32 %v231_v30, %v235_v32  ;;  %v436_v39 = vadd.f32 %v432_v33, %v223_v26  ;;  %v437_v41 = vadd.f32 %v433_v34, %v223_v26 }
 0x1ab   :  { %v522_v42 = vpack.c.bf16 %v239_v38, %v238_v36  ;;  %v440_v35 = vmul.f32 0.2, %v436_v39  ;;  %v441_v44 = vmul.f32 0.2, %v437_v41 }
 0x1ad   :  { %254 = vst [vmem:[%s793_s4] sm:$0xff] %v522_v42  ;;  %v444_v37 = vmax.f32 %v436_v39, %v440_v35  ;;  %v445_v45 = vmax.f32 %v437_v41, %v441_v44 }
 0x1af   :  { %v524_v48 = vpack.c.bf16 %v445_v45, %v444_v37 }
 0x1b1   :  { %520 = vst [vmem:[%s793_s4 + $0x10] sm:$0xff] %v524_v48 }
 0x1c4   :  { %v187_v50 = vpop.xlane.xlu1 %186 }
 0x1c5   :  { %v189_v52 = vmul.f32 0.00390625, %v187_v50 }
 0x1c7   :  { %v193_v54 = vsub.f32 %v189_v52, %v191_v53 }
 0x1c8   :  { %v413_v55 = vpop.xlane.xlu1 %412 }
 0x1c9   :  { %v195_v56 = vadd.f32 1e-05, %v193_v54  ;;  %v415_v58 = vmul.f32 0.00390625, %v413_v55 }
 0x1cb   :  { %582 = vrsqrt.f32 %v195_v56  ;;  %v419_v59 = vsub.f32 %v415_v58, %v417_v57 }
 0x1cc   :  { %v228_v7 = vpop.permute.xlu1 %227 }
 0x1cd   :  { %v421_v60 = vadd.f32 1e-05, %v419_v59 }
 0x1cf   :  { %584 = vrsqrt.f32 %v421_v60 }
 0x1d5   :  { %v583_v0 = vpop.eup %582 }
 0x1d6   :  { %v204_v1 = vmul.f32 %v583_v0, %v200_v61  ;;  %v205_v63 = vmul.f32 %v583_v0, %v201_v62 }
 0x1d8   :  { %v218_v4 = vmul.f32 %v763_v14, %v204_v1  ;;  %v219_v5 = vmul.f32 %v763_v14, %v205_v63 }
 0x1d9   :  { %v585_v6 = vpop.eup %584 }
 0x1da   :  { %v430_v8 = vmul.f32 %v585_v6, %v426_v2  ;;  %v431_v9 = vmul.f32 %v585_v6, %v427_v3  ;;  %v232_v10 = vadd.f32 %v228_v7, %v218_v4  ;;  %v233_v11 = vadd.f32 %v228_v7, %v219_v5 }
 0x1dc   :  { %v434_v43 = vmul.f32 %v430_v8, %v763_v14  ;;  %v435_v47 = vmul.f32 %v431_v9, %v763_v14  ;;  %v236_v12 = vmul.f32 0.2, %v232_v10  ;;  %v237_v13 = vmul.f32 0.2, %v233_v11 }
 0x1de   :  { %v240_v15 = vmax.f32 %v232_v10, %v236_v12  ;;  %v241_v40 = vmax.f32 %v233_v11, %v237_v13  ;;  %v438_v16 = vadd.f32 %v434_v43, %v228_v7  ;;  %v439_v46 = vadd.f32 %v435_v47, %v228_v7 }
 0x1e0   :  { %v523_v17 = vpack.c.bf16 %v241_v40, %v240_v15  ;;  %v442_v18 = vmul.f32 0.2, %v438_v16  ;;  %v443_v19 = vmul.f32 0.2, %v439_v46 }
 0x1e2   :  { %255 = vst [vmem:[%s793_s4 + $0x8] sm:$0xff] %v523_v17  ;;  %v446_v20 = vmax.f32 %v438_v16, %v442_v18  ;;  %v447_v21 = vmax.f32 %v439_v46, %v443_v19 }
 0x1e4   :  { %v525_v22 = vpack.c.bf16 %v447_v21, %v446_v20 }
 0x1e6   :  { %521 = vst [vmem:[%s793_s4 + $0x18] sm:$0xff] %v525_v22 }

// kernel: discriminator_forward.6
= control target key start
LH: loop header
LB: loop body
LE: loop exit
PB: predicated region body
PF: predicated region fallthrough
CT: control target
= control target key end

     0   :  { %v846_v36 = vmov 0   ;;  %vm227_vm0 = vcmask 523264   ;;  %vm361_vm1 = vcmask 519168   ;;  %s1110_s0 = inlined_call_operand.vmem [shape: bf16[2,256,64], index: 0, kind: input, shape index: {}]   ;;  %s1111_s1 = inlined_call_operand.vmem [shape: bf16[32,256], index: 1, kind: input, shape index: {}]   ;;  %s1112_s2 = inlined_call_operand.vmem [shape: f32[32,1], index: 2, kind: input, shape index: {}]   ;;  %s1113_s3 = inlined_call_operand.vmem [shape: f32[32,1], index: 3, kind: input, shape index: {}]   ;;  %s1114_s4 = inlined_call_operand.vmem [shape: bf16[2,32,64], index: 4, kind: output, shape index: {}]  }
   0x1   :  { %v792_v0 = vld [vmem:[%s1110_s0 + $0x40] sm:$0xff]   ;;  %v796_v4 = vld [vmem:[%s1110_s0 + $0x48] sm:$0xff]   ;;  %v800_v8 = vld [vmem:[%s1110_s0 + $0x50] sm:$0xff]   ;;  %791 = vset.pattern.permute.xlu1 %v846_v36  ;;  %790 = vset.pattern.permute.xlu0 %v846_v36 }
   0x2   :  { %v793_v1 = vld [vmem:[%s1110_s0 + $0xc0] sm:$0xff]   ;;  %733 = vmatprep.subr.bf16.mxu0 %v792_v0  ;;  %v797_v5 = vld [vmem:[%s1110_s0 + $0xc8] sm:$0xff]   ;;  %v801_v9 = vld [vmem:[%s1110_s0 + $0xd0] sm:$0xff]  }
   0x3   :  { %v794_v2 = vld [vmem:[%s1110_s0] sm:$0xff]   ;;  %761 = vmatprep.subr.bf16.mxu1 %v793_v1  ;;  %v798_v6 = vld [vmem:[%s1110_s0 + $0x8] sm:$0xff]   ;;  %v802_v10 = vld [vmem:[%s1110_s0 + $0x10] sm:$0xff]  }
   0x4   :  { %v795_v3 = vld [vmem:[%s1110_s0 + $0x80] sm:$0xff]   ;;  %734 = vmatpush3.bf16.msra.mxu0 %v794_v2  ;;  %v799_v7 = vld [vmem:[%s1110_s0 + $0x88] sm:$0xff]   ;;  %v803_v11 = vld [vmem:[%s1110_s0 + $0x90] sm:$0xff]  }
   0x5   :  { %762 = vmatpush3.bf16.msra.mxu1 %v795_v3  ;;  %735 = vmatprep.subr.bf16.mxu0 %v796_v4  ;;  %v804_v12 = vld [vmem:[%s1110_s0 + $0x58] sm:$0xff]   ;;  %v808_v16 = vld [vmem:[%s1110_s0 + $0x60] sm:$0xff]   ;;  %v812_v20 = vld [vmem:[%s1110_s0 + $0x68] sm:$0xff]  }
   0x6   :  { %763 = vmatprep.subr.bf16.mxu1 %v797_v5  ;;  %v805_v13 = vld [vmem:[%s1110_s0 + $0xd8] sm:$0xff]   ;;  %v809_v17 = vld [vmem:[%s1110_s0 + $0xe0] sm:$0xff]   ;;  %v813_v21 = vld [vmem:[%s1110_s0 + $0xe8] sm:$0xff]  }
   0x7   :  { %v806_v14 = vld [vmem:[%s1110_s0 + $0x18] sm:$0xff]   ;;  %v810_v18 = vld [vmem:[%s1110_s0 + $0x20] sm:$0xff]   ;;  %v814_v22 = vld [vmem:[%s1110_s0 + $0x28] sm:$0xff]  }
   0x8   :  { %736 = vmatpush3.bf16.msra.mxu0 %v798_v6  ;;  %v807_v15 = vld [vmem:[%s1110_s0 + $0x98] sm:$0xff]   ;;  %v811_v19 = vld [vmem:[%s1110_s0 + $0xa0] sm:$0xff]   ;;  %v815_v23 = vld [vmem:[%s1110_s0 + $0xa8] sm:$0xff]  }
   0x9   :  { %764 = vmatpush3.bf16.msra.mxu1 %v799_v7  ;;  %737 = vmatprep.subr.bf16.mxu0 %v800_v8  ;;  %v816_v24 = vld [vmem:[%s1110_s0 + $0x70] sm:$0xff]   ;;  %v820_v28 = vld [vmem:[%s1110_s0 + $0x78] sm:$0xff]   ;;  %v824_v32 = vld [vmem:[%s1111_s1] ss:$8 sps:$4 sm:$0xff]  }
   0xa   :  { %765 = vmatprep.subr.bf16.mxu1 %v801_v9  ;;  %v817_v25 = vld [vmem:[%s1110_s0 + $0xf0] sm:$0xff]   ;;  %v821_v29 = vld [vmem:[%s1110_s0 + $0xf8] sm:$0xff]   ;;  %v826_v33 = vld [vmem:[%s1111_s1 + $0x4] ss:$8 sps:$4 sm:$0xff]  }
   0xb   :  { %v818_v26 = vld [vmem:[%s1110_s0 + $0x30] sm:$0xff]   ;;  %v822_v30 = vld [vmem:[%s1110_s0 + $0x38] sm:$0xff]   ;;  %210 = vmatprep.mubr.bf16.mxu0 %v826_v33  ;;  %527 = vmatprep.mubr.bf16.mxu1 %v826_v33 }
   0xc   :  { %738 = vmatpush3.bf16.msra.mxu0 %v802_v10  ;;  %v819_v27 = vld [vmem:[%s1110_s0 + $0xb0] sm:$0xff]   ;;  %v823_v31 = vld [vmem:[%s1110_s0 + $0xb8] sm:$0xff]  }
   0xd   :  { %766 = vmatpush3.bf16.msra.mxu1 %v803_v11  ;;  %739 = vmatprep.subr.bf16.mxu0 %v804_v12  ;;  %v827_v34 = vld [vmem:[%s1111_s1 + $0x14] ss:$8 sps:$4 sm:$0xff]   ;;  %v829_v35 = vld [vmem:[%s1111_s1 + $0x10] ss:$8 sps:$4 sm:$0xff]  }
   0xe   :  { %767 = vmatprep.subr.bf16.mxu1 %v805_v13 }
  0x10   :  { %740 = vmatpush3.bf16.msra.mxu0 %v806_v14 }
  0x11   :  { %768 = vmatpush3.bf16.msra.mxu1 %v807_v15  ;;  %741 = vmatprep.subr.bf16.mxu0 %v808_v16 }
  0x12   :  { %769 = vmatprep.subr.bf16.mxu1 %v809_v17  ;;  %v23_v17 = vld [vmem:[%s1112_s2 + $0x8] sm:$0xff] }
  0x14   :  { %742 = vmatpush3.bf16.msra.mxu0 %v810_v18  ;;  %v24_v18 = vld [vmem:[%s1112_s2 + $0x10] sm:$0xff] }
  0x15   :  { %770 = vmatpush3.bf16.msra.mxu1 %v811_v19  ;;  %743 = vmatprep.subr.bf16.mxu0 %v812_v20  ;;  %v25_v19 = vld [vmem:[%s1112_s2 + $0x18] sm:$0xff]  ;;  %v22_v20 = vld [vmem:[%s1112_s2] sm:$0xff] }
  0x16   :  { %771 = vmatprep.subr.bf16.mxu1 %v813_v21  ;;  %v26_v21 = vld [vmem:[%s1113_s3] sm:$0xff] }
  0x18   :  { %744 = vmatpush3.bf16.msra.mxu0 %v814_v22  ;;  %v27_v22 = vld [vmem:[%s1113_s3 + $0x8] sm:$0xff] }
  0x19   :  { %772 = vmatpush3.bf16.msra.mxu1 %v815_v23  ;;  %745 = vmatprep.subr.bf16.mxu0 %v816_v24  ;;  %v28_v23 = vld [vmem:[%s1113_s3 + $0x10] sm:$0xff] }
  0x1a   :  { %773 = vmatprep.subr.bf16.mxu1 %v817_v25 }
  0x1c   :  { %746 = vmatpush3.bf16.msra.mxu0 %v818_v26 }
  0x1d   :  { %774 = vmatpush3.bf16.msra.mxu1 %v819_v27  ;;  %747 = vmatprep.subr.bf16.mxu0 %v820_v28  ;;  %v29_v28 = vld [vmem:[%s1113_s3 + $0x18] sm:$0xff] }
  0x1e   :  { %775 = vmatprep.subr.bf16.mxu1 %v821_v29 }
  0x20   :  { %748 = vmatpush3.bf16.msra.mxu0 %v822_v30 }
  0x21   :  { %776 = vmatpush3.bf16.msra.mxu1 %v823_v31 }
  0x23   :  { %211 = vmatmul.mubr.bf16.vlgmr.msra.gmra.mrb[0].mxu0 %v824_v32 }
  0x24   :  { %528 = vmatmul.mubr.bf16.vlgmr.msra.gmra.mrb[0].mxu1 %v824_v32  ;;  %218 = vmatprep.mubr.bf16.mxu0 %v827_v34 }
  0x25   :  { %535 = vmatprep.mubr.bf16.mxu1 %v827_v34 }
  0x2b   :  { %219 = vmatmul.mubr.bf16.gmra.mrb[4].mxu0 %v829_v35 }
  0x2c   :  { %536 = vmatmul.mubr.bf16.gmra.mrb[4].mxu1 %v829_v35 }
  0xf6   :  { %v749_v37 = vpop.f32.mrb[0].mxu0 }
  0xf7   :  { %v777_v38 = vpop.f32.mrb[0].mxu1  ;;  %v750_v39 = vpop.f32.mrb[1].mxu0 }
  0xf8   :  { %v778_v40 = vpop.f32.mrb[1].mxu1  ;;  %v980_v41 = vadd.f32 %v750_v39, %v749_v37  ;;  %v752_v43 = vpop.f32.mrb[2].mxu0 }
  0xf9   :  { %v982_v42 = vadd.f32 %v778_v40, %v777_v38  ;;  %v780_v44 = vpop.f32.mrb[2].mxu1  ;;  %v753_v45 = vpop.f32.mrb[3].mxu0 }
  0xfa   :  { %v781_v46 = vpop.f32.mrb[3].mxu1  ;;  %v984_v47 = vadd.f32 %v753_v45, %v752_v43  ;;  %v228_v49 = vsel %vm227_vm0, %v980_v41, 0.0  ;;  %v245_v3 = vmul.f32 %v980_v41, %v980_v41 }
  0xfb   :  { %v986_v48 = vadd.f32 %v781_v46, %v780_v44  ;;  %229 = vadd.xlane.f32.xlu0 %v228_v49  ;;  %v544_v52 = vsel %vm227_vm0, %v982_v42, 0.0  ;;  %v560_v8 = vmul.f32 %v982_v42, %v982_v42 }
  0xfc   :  { %v246_v51 = vmul.f32 %v984_v47, %v984_v47  ;;  %v231_v1 = vsel %vm227_vm0, %v984_v47, 0.0  ;;  %v249_v6 = vsel %vm227_vm0, %v245_v3, 0.0 }
  0xfd   :  { %v547_v50 = vsel %vm227_vm0, %v986_v48, 0.0  ;;  %v561_v60 = vmul.f32 %v986_v48, %v986_v48  ;;  %v564_v9 = vsel %vm227_vm0, %v560_v8, 0.0 }
  0xfe   :  { %548 = vadd.xlane.f32.xlu1 %v547_v50  ;;  %v755_v53 = vpop.f32.mrb[4].mxu0  ;;  %v252_v57 = vsel %vm227_vm0, %v246_v51, 0.0 }
  0xff   :  { %v783_v54 = vpop.f32.mrb[4].mxu1  ;;  %545 = vadd.xlane.f32.xlu0 %v544_v52  ;;  %v756_v55 = vpop.f32.mrb[5].mxu0  ;;  %v567_v5 = vsel %vm227_vm0, %v561_v60, 0.0 }
 0x100   :  { %v784_v56 = vpop.f32.mrb[5].mxu1  ;;  %v997_v58 = vadd.f32 %v756_v55, %v755_v53  ;;  %v758_v59 = vpop.f32.mrb[6].mxu0 }
 0x101   :  { %v1001_v61 = vadd.f32 %v784_v56, %v783_v54  ;;  %v786_v62 = vpop.f32.mrb[6].mxu1  ;;  %v759_v63 = vpop.f32.mrb[7].mxu0 }
 0x102   :  { %253 = vadd.xlane.f32.xlu1 %v252_v57  ;;  %v787_v0 = vpop.f32.mrb[7].mxu1  ;;  %v1005_v2 = vadd.f32 %v759_v63, %v758_v59  ;;  %v234_v7 = vsel %vm227_vm0, %v997_v58, 0.0  ;;  %v247_v12 = vmul.f32 %v997_v58, %v997_v58 }
 0x103   :  { %v1009_v4 = vadd.f32 %v787_v0, %v786_v62  ;;  %232 = vadd.xlane.f32.xlu0 %v231_v1  ;;  %v550_v11 = vsel %vm227_vm0, %v1001_v61, 0.0  ;;  %v562_v15 = vmul.f32 %v1001_v61, %v1001_v61 }
 0x104   :  { %v237_v10 = vsel %vm227_vm0, %v1005_v2, 0.0  ;;  %v255_v14 = vsel %vm227_vm0, %v247_v12, 0.0  ;;  %v248_v24 = vmul.f32 %v1005_v2, %v1005_v2 }
 0x105   :  { %v553_v13 = vsel %vm227_vm0, %v1009_v4, 0.0  ;;  %v570_v16 = vsel %vm227_vm0, %v562_v15, 0.0  ;;  %v563_v26 = vmul.f32 %v1009_v4, %v1009_v4 }
 0x106   :  { %568 = vadd.xlane.f32.xlu1 %v567_v5  ;;  %v258_v25 = vsel %vm227_vm0, %v248_v24, 0.0 }
 0x107   :  { %250 = vadd.xlane.f32.xlu0 %v249_v6  ;;  %v573_v27 = vsel %vm227_vm0, %v563_v26, 0.0 }
 0x10a   :  { %235 = vadd.xlane.f32.xlu1 %v234_v7 }
 0x10b   :  { %565 = vadd.xlane.f32.xlu0 %v564_v9 }
 0x10e   :  { %238 = vadd.xlane.f32.xlu1 %v237_v10 }
 0x10f   :  { %551 = vadd.xlane.f32.xlu0 %v550_v11 }
 0x112   :  { %554 = vadd.xlane.f32.xlu1 %v553_v13 }
 0x113   :  { %256 = vadd.xlane.f32.xlu0 %v255_v14 }
 0x117   :  { %571 = vadd.xlane.f32.xlu0 %v570_v16 }
 0x123   :  { %296 = vperm.xlu1 %791, %v23_v17  }
 0x127   :  { %301 = vperm.xlu1 %791, %v24_v18  }
 0x12b   :  { %306 = vperm.xlu1 %791, %v25_v19  }
 0x12d   :  { %291 = vperm.xlu0 %790, %v22_v20  }
 0x12f   :  { %315 = vperm.xlu1 %791, %v26_v21  }
 0x133   :  { %320 = vperm.xlu1 %791, %v27_v22  }
 0x137   :  { %325 = vperm.xlu1 %791, %v28_v23  }
 0x15b   :  { %259 = vadd.xlane.f32.xlu1 %v258_v25 }
 0x15f   :  { %574 = vadd.xlane.f32.xlu1 %v573_v27 }
 0x170   :  { %330 = vperm.xlu1 %791, %v29_v28  }
 0x188   :  { %v230_v29 = vpop.xlane.xlu0 %229 }
 0x189   :  { %v241_v34 = vmul.f32 0.015625, %v230_v29 }
 0x18b   :  { %v549_v30 = vpop.xlane.xlu1 %548  ;;  %v265_v44 = vmul.f32 %v241_v34, %v241_v34  ;;  %v281_v21 = vsub.f32 %v980_v41, %v241_v34 }
 0x18c   :  { %v546_v31 = vpop.xlane.xlu0 %545  ;;  %v557_v35 = vmul.f32 0.015625, %v549_v30 }
 0x18d   :  { %v556_v50 = vmul.f32 0.015625, %v546_v31 }
 0x18e   :  { %v581_v45 = vmul.f32 %v557_v35, %v557_v35  ;;  %v597_v25 = vsub.f32 %v986_v48, %v557_v35 }
 0x18f   :  { %v254_v32 = vpop.xlane.xlu1 %253  ;;  %v580_v56 = vmul.f32 %v556_v50, %v556_v50  ;;  %v596_v22 = vsub.f32 %v982_v42, %v556_v50 }
 0x190   :  { %v233_v33 = vpop.xlane.xlu0 %232  ;;  %v262_v38 = vmul.f32 0.015625, %v254_v32 }
 0x191   :  { %v242_v36 = vmul.f32 0.015625, %v233_v33 }
 0x193   :  { %v569_v37 = vpop.xlane.xlu1 %568  ;;  %v266_v39 = vmul.f32 %v242_v36, %v242_v36  ;;  %v282_v27 = vsub.f32 %v984_v47, %v242_v36 }
 0x194   :  { %v577_v40 = vmul.f32 0.015625, %v569_v37  ;;  %v251_v43 = vpop.xlane.xlu0 %250 }
 0x195   :  { %v270_v46 = vsub.f32 %v262_v38, %v266_v39  ;;  %v261_v49 = vmul.f32 0.015625, %v251_v43 }
 0x196   :  { %v585_v52 = vsub.f32 %v577_v40, %v581_v45 }
 0x197   :  { %v236_v51 = vpop.xlane.xlu1 %235  ;;  %v269_v53 = vsub.f32 %v261_v49, %v265_v44  ;;  %v274_v55 = vadd.f32 1e-05, %v270_v46 }
 0x198   :  { %v566_v54 = vpop.xlane.xlu0 %565  ;;  %v589_v62 = vadd.f32 1e-05, %v585_v52  ;;  %v243_v1 = vmul.f32 0.015625, %v236_v51 }
 0x199   :  { %v273_v57 = vadd.f32 1e-05, %v269_v53  ;;  %v576_v59 = vmul.f32 0.015625, %v566_v54  ;;  %830 = vrsqrt.f32 %v274_v55 }
 0x19a   :  { %v267_v7 = vmul.f32 %v243_v1, %v243_v1  ;;  %v283_v42 = vsub.f32 %v997_v58, %v243_v1 }
 0x19b   :  { %v1060_v60 = vpop.xlane.xlu1 %238  ;;  %v584_v63 = vsub.f32 %v576_v59, %v580_v56  ;;  %832 = vrsqrt.f32 %v273_v57 }
 0x19c   :  { %v552_v0 = vpop.xlane.xlu0 %551  ;;  %834 = vrsqrt.f32 %v589_v62 }
 0x19d   :  { %v588_v3 = vadd.f32 1e-05, %v584_v63  ;;  %v558_v8 = vmul.f32 0.015625, %v552_v0 }
 0x19f   :  { %v1062_v5 = vpop.xlane.xlu1 %554  ;;  %836 = vrsqrt.f32 %v588_v3  ;;  %v582_v13 = vmul.f32 %v558_v8, %v558_v8  ;;  %v598_v50 = vsub.f32 %v1001_v61, %v558_v8 }
 0x1a0   :  { %v257_v6 = vpop.xlane.xlu0 %256 }
 0x1a1   :  { %v263_v9 = vmul.f32 0.015625, %v257_v6 }
 0x1a3   :  { %v297_v10 = vpop.permute.xlu1 %296  ;;  %v271_v11 = vsub.f32 %v263_v9, %v267_v7  ;;  %v831_v17 = vpop.eup %830 }
 0x1a4   :  { %v572_v12 = vpop.xlane.xlu0 %571  ;;  %v286_v32 = vmul.f32 %v831_v17, %v282_v27 }
 0x1a5   :  { %v275_v14 = vadd.f32 1e-05, %v271_v11  ;;  %v578_v15 = vmul.f32 0.015625, %v572_v12  ;;  %v833_v19 = vpop.eup %832  ;;  %v244_v12 = vmul.f32 0.015625, %v1060_v60 }
 0x1a6   :  { %v835_v20 = vpop.eup %834  ;;  %v285_v28 = vmul.f32 %v833_v19, %v281_v21  ;;  %v310_v40 = vmul.f32 %v297_v10, %v286_v32 }
 0x1a7   :  { %v302_v16 = vpop.permute.xlu1 %301  ;;  %838 = vrsqrt.f32 %v275_v14  ;;  %v586_v18 = vsub.f32 %v578_v15, %v582_v13  ;;  %v601_v31 = vmul.f32 %v835_v20, %v597_v25  ;;  %v268_v14 = vmul.f32 %v244_v12, %v244_v12 }
 0x1a8   :  { %v559_v15 = vmul.f32 0.015625, %v1062_v5 }
 0x1a9   :  { %v590_v23 = vadd.f32 1e-05, %v586_v18  ;;  %v837_v24 = vpop.eup %836  ;;  %v605_v48 = vmul.f32 %v601_v31, %v297_v10 }
 0x1aa   :  { %v600_v29 = vmul.f32 %v837_v24, %v596_v22  ;;  %v583_v19 = vmul.f32 %v559_v15, %v559_v15  ;;  %v284_v24 = vsub.f32 %v1005_v2, %v244_v12  ;;  %v599_v60 = vsub.f32 %v1009_v4, %v559_v15 }
 0x1ab   :  { %v1067_v26 = vpop.permute.xlu1 %306  ;;  %840 = vrsqrt.f32 %v590_v23 }
 0x1ac   :  { %v292_v30 = vpop.permute.xlu0 %291 }
 0x1ad   :  { %v309_v33 = vmul.f32 %v292_v30, %v285_v28  ;;  %v604_v37 = vmul.f32 %v600_v29, %v292_v30 }
 0x1af   :  { %v316_v38 = vpop.permute.xlu1 %315 }
 0x1b0   :  { %v333_v41 = vadd.f32 %v316_v38, %v309_v33  ;;  %v608_v34 = vadd.f32 %v604_v37, %v316_v38 }
 0x1b1   :  { %v839_v39 = vpop.eup %838 }
 0x1b2   :  { %v337_v35 = vmul.f32 0.2, %v333_v41  ;;  %v612_v43 = vmul.f32 0.2, %v608_v34  ;;  %v287_v44 = vmul.f32 %v839_v39, %v283_v42 }
 0x1b3   :  { %v321_v47 = vpop.permute.xlu1 %320 }
 0x1b4   :  { %v341_v36 = vmax.f32 %v333_v41, %v337_v35  ;;  %v616_v45 = vmax.f32 %v608_v34, %v612_v43  ;;  %v334_v46 = vadd.f32 %v321_v47, %v310_v40  ;;  %v609_v49 = vadd.f32 %v605_v48, %v321_v47 }
 0x1b5   :  { %v311_v51 = vmul.f32 %v302_v16, %v287_v44  ;;  %v841_v52 = vpop.eup %840 }
 0x1b6   :  { %v725_v53 = vpack.c.bf16 %v341_v36, %v341_v36  ;;  %v729_v54 = vpack.c.bf16 %v616_v45, %v616_v45  ;;  %v338_v55 = vmul.f32 0.2, %v334_v46  ;;  %v613_v58 = vmul.f32 0.2, %v609_v49 }
 0x1b7   :  { %v602_v56 = vmul.f32 %v841_v52, %v598_v50  ;;  %v326_v57 = vpop.permute.xlu1 %325 }
 0x1b8   :  { %362 = vst.msk [vmem:[%s1114_s4] sm:$0xf] %vm361_vm1, %v725_v53  ;;  %721 = vst.msk [vmem:[%s1114_s4 + $0x10] sm:$0xf] %vm361_vm1, %v729_v54  ;;  %v342_v61 = vmax.f32 %v334_v46, %v338_v55  ;;  %v617_v59 = vmax.f32 %v609_v49, %v613_v58  ;;  %v335_v62 = vadd.f32 %v326_v57, %v311_v51 }
 0x1b9   :  { %v606_v63 = vmul.f32 %v602_v56, %v302_v16 }
 0x1ba   :  { %v726_v0 = vpack.c.bf16 %v342_v61, %v342_v61  ;;  %v730_v1 = vpack.c.bf16 %v617_v59, %v617_v59  ;;  %v339_v3 = vmul.f32 0.2, %v335_v62 }
 0x1bb   :  { %v610_v6 = vadd.f32 %v606_v63, %v326_v57 }
 0x1bc   :  { %363 = vst.msk [vmem:[%s1114_s4 + $0x4] sm:$0xf] %vm361_vm1, %v726_v0  ;;  %722 = vst.msk [vmem:[%s1114_s4 + $0x14] sm:$0xf] %vm361_vm1, %v730_v1  ;;  %v343_v7 = vmax.f32 %v335_v62, %v339_v3 }
 0x1bd   :  { %v614_v8 = vmul.f32 0.2, %v610_v6 }
 0x1be   :  { %v727_v9 = vpack.c.bf16 %v343_v7, %v343_v7 }
 0x1bf   :  { %v618_v10 = vmax.f32 %v610_v6, %v614_v8 }
 0x1c0   :  { %364 = vst.msk [vmem:[%s1114_s4 + $0x8] sm:$0xf] %vm361_vm1, %v727_v9 }
 0x1c1   :  { %v731_v11 = vpack.c.bf16 %v618_v10, %v618_v10 }
 0x1c3   :  { %723 = vst.msk [vmem:[%s1114_s4 + $0x18] sm:$0xf] %vm361_vm1, %v731_v11 }
 0x1e8   :  { %v260_v13 = vpop.xlane.xlu1 %259 }
 0x1e9   :  { %v264_v16 = vmul.f32 0.015625, %v260_v13 }
 0x1eb   :  { %v272_v17 = vsub.f32 %v264_v16, %v268_v14 }
 0x1ec   :  { %v575_v18 = vpop.xlane.xlu1 %574 }
 0x1ed   :  { %v276_v20 = vadd.f32 1e-05, %v272_v17  ;;  %v579_v21 = vmul.f32 0.015625, %v575_v18 }
 0x1ef   :  { %842 = vrsqrt.f32 %v276_v20  ;;  %v587_v22 = vsub.f32 %v579_v21, %v583_v19 }
 0x1f0   :  { %v331_v5 = vpop.permute.xlu1 %330 }
 0x1f1   :  { %v591_v23 = vadd.f32 1e-05, %v587_v22 }
 0x1f3   :  { %844 = vrsqrt.f32 %v591_v23 }
 0x1f9   :  { %v843_v25 = vpop.eup %842 }
 0x1fa   :  { %v288_v27 = vmul.f32 %v843_v25, %v284_v24 }
 0x1fc   :  { %v312_v28 = vmul.f32 %v1067_v26, %v288_v27 }
 0x1fd   :  { %v845_v29 = vpop.eup %844 }
 0x1fe   :  { %v603_v30 = vmul.f32 %v845_v29, %v599_v60  ;;  %v336_v31 = vadd.f32 %v331_v5, %v312_v28 }
 0x200   :  { %v607_v32 = vmul.f32 %v603_v30, %v1067_v26  ;;  %v340_v33 = vmul.f32 0.2, %v336_v31 }
 0x202   :  { %v344_v37 = vmax.f32 %v336_v31, %v340_v33  ;;  %v611_v38 = vadd.f32 %v607_v32, %v331_v5 }
 0x204   :  { %v728_v41 = vpack.c.bf16 %v344_v37, %v344_v37  ;;  %v615_v34 = vmul.f32 0.2, %v611_v38 }
 0x206   :  { %365 = vst.msk [vmem:[%s1114_s4 + $0xc] sm:$0xf] %vm361_vm1, %v728_v41  ;;  %v619_v2 = vmax.f32 %v611_v38, %v615_v34 }
 0x208   :  { %v732_v4 = vpack.c.bf16 %v619_v2, %v619_v2 }
 0x20a   :  { %724 = vst.msk [vmem:[%s1114_s4 + $0x1c] sm:$0xf] %vm361_vm1, %v732_v4 }

// kernel: discriminator_forward.7
= control target key start
LH: loop header
LB: loop body
LE: loop exit
PB: predicated region body
PF: predicated region fallthrough
CT: control target
= control target key end

     0   :  { %v1863_v1 = vmov 0   ;;  %vm532_vm0 = vcmask 130048   ;;  %vm1419_vm1 = vcmask 1040384   ;;  %vm1429_vm2 = vcmask 1024   ;;  %s2557_s0 = inlined_call_operand.vmem [shape: bf16[2,512,16], index: 0, kind: input, shape index: {}]   ;;  %s2558_s1 = inlined_call_operand.vmem [shape: bf16[64,512], index: 1, kind: input, shape index: {}]   ;;  %s2559_s2 = inlined_call_operand.vmem [shape: f32[64,1], index: 2, kind: input, shape index: {}]   ;;  %s2560_s3 = inlined_call_operand.vmem [shape: f32[64,1], index: 3, kind: input, shape index: {}]   ;;  %s2561_s4 = inlined_call_operand.vmem [shape: f32[64,16], index: 4, kind: input, shape index: {}]   ;;  %s2562_s5 = inlined_call_operand.<no memory space> [shape: f32[1,1], index: 5, kind: input, shape index: {}]   ;;  %s2563_s6 = inlined_call_operand.vmem [shape: f32[2,1], index: 6, kind: output, shape index: {}]  }
   0x1   :  { %v1743_v0 = vld [vmem:[%s2557_s0 + $0x40] sm:$0xff]   ;;  %1742 = vset.pattern.permute.xlu1 %v1863_v1  ;;  %1741 = vset.pattern.permute.xlu0 %v1863_v1  ;;  %v1747_v5 = vld [vmem:[%s2557_s0 + $0x48] sm:$0xff]   ;;  %v1751_v9 = vld [vmem:[%s2557_s0 + $0x50] sm:$0xff]  }
   0x2   :  { %v1744_v2 = vld [vmem:[%s2557_s0 + $0xc0] sm:$0xff]   ;;  %1580 = vmatprep.subr.bf16.mxu0 %v1743_v0  ;;  %v1748_v6 = vld [vmem:[%s2557_s0 + $0xc8] sm:$0xff]   ;;  %v1752_v10 = vld [vmem:[%s2557_s0 + $0xd0] sm:$0xff]  }
   0x3   :  { %v1745_v3 = vld [vmem:[%s2557_s0] sm:$0xff]   ;;  %1620 = vmatprep.subr.bf16.mxu1 %v1744_v2  ;;  %v1749_v7 = vld [vmem:[%s2557_s0 + $0x8] sm:$0xff]   ;;  %v1753_v11 = vld [vmem:[%s2557_s0 + $0x10] sm:$0xff]  }
   0x4   :  { %v1746_v4 = vld [vmem:[%s2557_s0 + $0x80] sm:$0xff]   ;;  %1581 = vmatpush3.bf16.msra.mxu0 %v1745_v3  ;;  %v1750_v8 = vld [vmem:[%s2557_s0 + $0x88] sm:$0xff]   ;;  %v1754_v12 = vld [vmem:[%s2557_s0 + $0x90] sm:$0xff]  }
   0x5   :  { %1621 = vmatpush3.bf16.msra.mxu1 %v1746_v4  ;;  %1582 = vmatprep.subr.bf16.mxu0 %v1747_v5  ;;  %v1755_v13 = vld [vmem:[%s2557_s0 + $0x58] sm:$0xff]   ;;  %v1759_v17 = vld [vmem:[%s2557_s0 + $0x60] sm:$0xff]   ;;  %v1763_v21 = vld [vmem:[%s2557_s0 + $0x68] sm:$0xff]  }
   0x6   :  { %1622 = vmatprep.subr.bf16.mxu1 %v1748_v6  ;;  %v1756_v14 = vld [vmem:[%s2557_s0 + $0xd8] sm:$0xff]   ;;  %v1760_v18 = vld [vmem:[%s2557_s0 + $0xe0] sm:$0xff]   ;;  %v1764_v22 = vld [vmem:[%s2557_s0 + $0xe8] sm:$0xff]  }
   0x7   :  { %v1757_v15 = vld [vmem:[%s2557_s0 + $0x18] sm:$0xff]   ;;  %v1761_v19 = vld [vmem:[%s2557_s0 + $0x20] sm:$0xff]   ;;  %v1765_v23 = vld [vmem:[%s2557_s0 + $0x28] sm:$0xff]  }
   0x8   :  { %1583 = vmatpush3.bf16.msra.mxu0 %v1749_v7  ;;  %v1758_v16 = vld [vmem:[%s2557_s0 + $0x98] sm:$0xff]   ;;  %v1762_v20 = vld [vmem:[%s2557_s0 + $0xa0] sm:$0xff]   ;;  %v1766_v24 = vld [vmem:[%s2557_s0 + $0xa8] sm:$0xff]  }
   0x9   :  { %1623 = vmatpush3.bf16.msra.mxu1 %v1750_v8  ;;  %1584 = vmatprep.subr.bf16.mxu0 %v1751_v9  ;;  %v1767_v25 = vld [vmem:[%s2557_s0 + $0x70] sm:$0xff]   ;;  %v1771_v29 = vld [vmem:[%s2557_s0 + $0x78] sm:$0xff]   ;;  %v1781_v37 = vld [vmem:[%s2557_s0 + $0x140] sm:$0xff]  }
   0xa   :  { %1624 = vmatprep.subr.bf16.mxu1 %v1752_v10  ;;  %v1768_v26 = vld [vmem:[%s2557_s0 + $0xf0] sm:$0xff]   ;;  %v1772_v30 = vld [vmem:[%s2557_s0 + $0xf8] sm:$0xff]   ;;  %v1782_v38 = vld [vmem:[%s2557_s0 + $0x1c0] sm:$0xff]  }
   0xb   :  { %v1769_v27 = vld [vmem:[%s2557_s0 + $0x30] sm:$0xff]   ;;  %v1773_v31 = vld [vmem:[%s2557_s0 + $0x38] sm:$0xff]   ;;  %v1783_v39 = vld [vmem:[%s2557_s0 + $0x100] sm:$0xff]  }
   0xc   :  { %1585 = vmatpush3.bf16.msra.mxu0 %v1753_v11  ;;  %v1770_v28 = vld [vmem:[%s2557_s0 + $0xb0] sm:$0xff]   ;;  %v1774_v32 = vld [vmem:[%s2557_s0 + $0xb8] sm:$0xff]   ;;  %v1784_v40 = vld [vmem:[%s2557_s0 + $0x180] sm:$0xff]  }
   0xd   :  { %1625 = vmatpush3.bf16.msra.mxu1 %v1754_v12  ;;  %1586 = vmatprep.subr.bf16.mxu0 %v1755_v13  ;;  %v1998_v33 = vld [vmem:[%s2558_s1] ss:$16 sps:$4 sm:$0xff]   ;;  %v2003_v34 = vld [vmem:[%s2558_s1 + $0x4] ss:$16 sps:$4 sm:$0xff]   ;;  %v2008_v35 = vld [vmem:[%s2558_s1 + $0x8] ss:$16 sps:$4 sm:$0xff]  }
   0xe   :  { %1626 = vmatprep.subr.bf16.mxu1 %v1756_v14  ;;  %v2013_v36 = vld [vmem:[%s2558_s1 + $0xc] ss:$16 sps:$4 sm:$0xff]   ;;  %434 = vmatprep.mubr.bf16.mxu0 %v2003_v34  ;;  %v2046_v45 = vld [vmem:[%s2558_s1 + $0x24] ss:$16 sps:$4 sm:$0xff]   ;;  %v2056_v47 = vld [vmem:[%s2558_s1 + $0x20] ss:$16 sps:$4 sm:$0xff]  }
   0xf   :  { %499 = vmatprep.mubr.bf16.mxu1 %v2013_v36  ;;  %v1785_v41 = vld [vmem:[%s2557_s0 + $0x148] sm:$0xff]   ;;  %v1795_v49 = vld [vmem:[%s2557_s0 + $0x150] sm:$0xff]   ;;  %v1799_v53 = vld [vmem:[%s2557_s0 + $0x158] sm:$0xff]  }
  0x10   :  { %1587 = vmatpush3.bf16.msra.mxu0 %v1757_v15  ;;  %v1786_v42 = vld [vmem:[%s2557_s0 + $0x1c8] sm:$0xff]   ;;  %v1796_v50 = vld [vmem:[%s2557_s0 + $0x1d0] sm:$0xff]   ;;  %v1800_v54 = vld [vmem:[%s2557_s0 + $0x1d8] sm:$0xff]  }
  0x11   :  { %1627 = vmatpush3.bf16.msra.mxu1 %v1758_v16  ;;  %1588 = vmatprep.subr.bf16.mxu0 %v1759_v17  ;;  %v1787_v43 = vld [vmem:[%s2557_s0 + $0x108] sm:$0xff]   ;;  %v1797_v51 = vld [vmem:[%s2557_s0 + $0x110] sm:$0xff]   ;;  %v1801_v55 = vld [vmem:[%s2557_s0 + $0x118] sm:$0xff]  }
  0x12   :  { %1628 = vmatprep.subr.bf16.mxu1 %v1760_v18  ;;  %v1788_v44 = vld [vmem:[%s2557_s0 + $0x188] sm:$0xff]   ;;  %v1798_v52 = vld [vmem:[%s2557_s0 + $0x190] sm:$0xff]   ;;  %v1802_v56 = vld [vmem:[%s2557_s0 + $0x198] sm:$0xff]  }
  0x13   :  { %v2051_v46 = vld [vmem:[%s2558_s1 + $0x2c] ss:$16 sps:$4 sm:$0xff]   ;;  %v2062_v48 = vld [vmem:[%s2558_s1 + $0x28] ss:$16 sps:$4 sm:$0xff]   ;;  %v2094_v57 = vld [vmem:[%s2558_s1 + $0x44] ss:$16 sps:$4 sm:$0xff]  }
  0x14   :  { %1589 = vmatpush3.bf16.msra.mxu0 %v1761_v19  ;;  %v2099_v58 = vld [vmem:[%s2558_s1 + $0x4c] ss:$16 sps:$4 sm:$0xff]   ;;  %v2104_v59 = vld [vmem:[%s2558_s1 + $0x40] ss:$16 sps:$4 sm:$0xff]   ;;  %v2109_v60 = vld [vmem:[%s2558_s1 + $0x48] ss:$16 sps:$4 sm:$0xff]  }
  0x15   :  { %1629 = vmatpush3.bf16.msra.mxu1 %v1762_v20  ;;  %1590 = vmatprep.subr.bf16.mxu0 %v1763_v21  ;;  %v1809_v61 = vld [vmem:[%s2557_s0 + $0x160] sm:$0xff]   ;;  %v1813_v1 = vld [vmem:[%s2557_s0 + $0x168] sm:$0xff]   ;;  %v1823_v9 = vld [vmem:[%s2557_s0 + $0x170] sm:$0xff]  }
  0x16   :  { %1630 = vmatprep.subr.bf16.mxu1 %v1764_v22  ;;  %v1810_v62 = vld [vmem:[%s2557_s0 + $0x1e0] sm:$0xff]   ;;  %v1814_v2 = vld [vmem:[%s2557_s0 + $0x1e8] sm:$0xff]   ;;  %v1824_v10 = vld [vmem:[%s2557_s0 + $0x1f0] sm:$0xff]  }
  0x17   :  { %v1811_v63 = vld [vmem:[%s2557_s0 + $0x120] sm:$0xff]   ;;  %v1815_v3 = vld [vmem:[%s2557_s0 + $0x128] sm:$0xff]   ;;  %v1825_v11 = vld [vmem:[%s2557_s0 + $0x130] sm:$0xff]  }
  0x18   :  { %1591 = vmatpush3.bf16.msra.mxu0 %v1765_v23  ;;  %v1812_v0 = vld [vmem:[%s2557_s0 + $0x1a0] sm:$0xff]   ;;  %v1816_v4 = vld [vmem:[%s2557_s0 + $0x1a8] sm:$0xff]   ;;  %v1826_v12 = vld [vmem:[%s2557_s0 + $0x1b0] sm:$0xff]  }
  0x19   :  { %1631 = vmatpush3.bf16.msra.mxu1 %v1766_v24  ;;  %1592 = vmatprep.subr.bf16.mxu0 %v1767_v25  ;;  %v1817_v5 = vld [vmem:[%s2558_s1 + $0x64] ss:$16 sps:$4 sm:$0xff]   ;;  %v1819_v6 = vld [vmem:[%s2558_s1 + $0x6c] ss:$16 sps:$4 sm:$0xff]   ;;  %v1821_v7 = vld [vmem:[%s2558_s1 + $0x60] ss:$16 sps:$4 sm:$0xff]  }
  0x1a   :  { %1632 = vmatprep.subr.bf16.mxu1 %v1768_v26  ;;  %v1822_v8 = vld [vmem:[%s2558_s1 + $0x68] ss:$16 sps:$4 sm:$0xff]   ;;  %v44_v18 = vld [vmem:[%s2559_s2 + $0x10] sm:$0xff]  ;;  %v42_v19 = vld [vmem:[%s2559_s2] sm:$0xff] }
  0x1b   :  { %v1827_v13 = vld [vmem:[%s2557_s0 + $0x178] sm:$0xff]   ;;  %v43_v17 = vld [vmem:[%s2559_s2 + $0x8] sm:$0xff]  ;;  %656 = vperm.xlu0 %1741, %v42_v19   ;;  %v50_v22 = vld [vmem:[%s2560_s3] sm:$0xff] }
  0x1c   :  { %1593 = vmatpush3.bf16.msra.mxu0 %v1769_v27  ;;  %v1828_v14 = vld [vmem:[%s2557_s0 + $0x1f8] sm:$0xff]   ;;  %661 = vperm.xlu1 %1742, %v43_v17   ;;  %v47_v21 = vld [vmem:[%s2559_s2 + $0x28] sm:$0xff]  ;;  %v52_v26 = vld [vmem:[%s2560_s3 + $0x10] sm:$0xff] }
  0x1d   :  { %1633 = vmatpush3.bf16.msra.mxu1 %v1770_v28  ;;  %1594 = vmatprep.subr.bf16.mxu0 %v1771_v29  ;;  %v1829_v15 = vld [vmem:[%s2557_s0 + $0x138] sm:$0xff]   ;;  %v55_v23 = vld [vmem:[%s2560_s3 + $0x28] sm:$0xff]  ;;  %v46_v28 = vld [vmem:[%s2559_s2 + $0x20] sm:$0xff] }
  0x1e   :  { %1634 = vmatprep.subr.bf16.mxu1 %v1772_v30  ;;  %v1830_v16 = vld [vmem:[%s2557_s0 + $0x1b8] sm:$0xff]   ;;  %v51_v24 = vld [vmem:[%s2560_s3 + $0x8] sm:$0xff]  ;;  %v54_v29 = vld [vmem:[%s2560_s3 + $0x20] sm:$0xff] }
  0x1f   :  { %v45_v20 = vld [vmem:[%s2559_s2 + $0x18] sm:$0xff]  ;;  %681 = vperm.xlu0 %1741, %v47_v21   ;;  %v48_v30 = vld [vmem:[%s2559_s2 + $0x30] sm:$0xff] }
  0x20   :  { %1595 = vmatpush3.bf16.msra.mxu0 %v1773_v31  ;;  %666 = vperm.xlu1 %1742, %v44_v18   ;;  %v49_v25 = vld [vmem:[%s2559_s2 + $0x38] sm:$0xff] }
  0x21   :  { %1635 = vmatpush3.bf16.msra.mxu1 %v1774_v32  ;;  %1660 = vmatprep.subr.bf16.mxu0 %v1781_v37  ;;  %v53_v27 = vld [vmem:[%s2560_s3 + $0x18] sm:$0xff] }
  0x22   :  { %1700 = vmatprep.subr.bf16.mxu1 %v1782_v38 }
  0x23   :  { %435 = vmatmul.mubr.bf16.vlgmr.msra.gmra.mrb[0].mxu0 %v1998_v33  ;;  %729 = vperm.xlu0 %1741, %v55_v23  }
  0x24   :  { %500 = vmatmul.mubr.bf16.vlgmr.msra.gmra.mrb[0].mxu1 %v2008_v35  ;;  %1661 = vmatpush3.bf16.msra.mxu0 %v1783_v39 }
  0x25   :  { %1701 = vmatpush3.bf16.msra.mxu1 %v1784_v40  ;;  %1662 = vmatprep.subr.bf16.mxu0 %v1785_v41 }
  0x26   :  { %1702 = vmatprep.subr.bf16.mxu1 %v1786_v42  ;;  %442 = vmatprep.mubr.bf16.mxu0 %v2046_v45 }
  0x27   :  { %507 = vmatprep.mubr.bf16.mxu1 %v2051_v46  ;;  %671 = vperm.xlu1 %1742, %v45_v20  }
  0x28   :  { %1663 = vmatpush3.bf16.msra.mxu0 %v1787_v43  ;;  %691 = vperm.xlu0 %1741, %v49_v25  }
  0x29   :  { %1703 = vmatpush3.bf16.msra.mxu1 %v1788_v44  ;;  %1664 = vmatprep.subr.bf16.mxu0 %v1795_v49 }
  0x2a   :  { %1704 = vmatprep.subr.bf16.mxu1 %v1796_v50 }
  0x2b   :  { %443 = vmatmul.mubr.bf16.gmra.mrb[4].mxu0 %v2056_v47  ;;  %704 = vperm.xlu1 %1742, %v50_v22  }
  0x2c   :  { %508 = vmatmul.mubr.bf16.gmra.mrb[4].mxu1 %v2062_v48  ;;  %1665 = vmatpush3.bf16.msra.mxu0 %v1797_v51 }
  0x2d   :  { %1705 = vmatpush3.bf16.msra.mxu1 %v1798_v52  ;;  %1666 = vmatprep.subr.bf16.mxu0 %v1799_v53 }
  0x2e   :  { %1706 = vmatprep.subr.bf16.mxu1 %v1800_v54  ;;  %450 = vmatprep.mubr.bf16.mxu0 %v2094_v57 }
  0x2f   :  { %515 = vmatprep.mubr.bf16.mxu1 %v2099_v58  ;;  %709 = vperm.xlu1 %1742, %v51_v24  }
  0x30   :  { %1667 = vmatpush3.bf16.msra.mxu0 %v1801_v55 }
  0x31   :  { %1707 = vmatpush3.bf16.msra.mxu1 %v1802_v56  ;;  %1668 = vmatprep.subr.bf16.mxu0 %v1809_v61 }
  0x32   :  { %1708 = vmatprep.subr.bf16.mxu1 %v1810_v62 }
  0x33   :  { %451 = vmatmul.mubr.bf16.gmra.mrb[8].mxu0 %v2104_v59  ;;  %714 = vperm.xlu1 %1742, %v52_v26  }
  0x34   :  { %516 = vmatmul.mubr.bf16.gmra.mrb[8].mxu1 %v2109_v60  ;;  %1669 = vmatpush3.bf16.msra.mxu0 %v1811_v63 }
  0x35   :  { %1709 = vmatpush3.bf16.msra.mxu1 %v1812_v0  ;;  %1670 = vmatprep.subr.bf16.mxu0 %v1813_v1 }
  0x36   :  { %1710 = vmatprep.subr.bf16.mxu1 %v1814_v2  ;;  %458 = vmatprep.mubr.bf16.mxu0 %v1817_v5 }
  0x37   :  { %523 = vmatprep.mubr.bf16.mxu1 %v1819_v6  ;;  %719 = vperm.xlu1 %1742, %v53_v27  }
  0x38   :  { %1671 = vmatpush3.bf16.msra.mxu0 %v1815_v3 }
  0x39   :  { %1711 = vmatpush3.bf16.msra.mxu1 %v1816_v4  ;;  %1672 = vmatprep.subr.bf16.mxu0 %v1823_v9 }
  0x3a   :  { %1712 = vmatprep.subr.bf16.mxu1 %v1824_v10 }
  0x3b   :  { %459 = vmatmul.mubr.bf16.gmra.mrb[12].mxu0 %v1821_v7  ;;  %676 = vperm.xlu1 %1742, %v46_v28  }
  0x3c   :  { %524 = vmatmul.mubr.bf16.gmra.mrb[12].mxu1 %v1822_v8  ;;  %1112 = vmatprep.mubr.bf16.mxu0 %v2003_v34 }
  0x3d   :  { %1177 = vmatprep.mubr.bf16.mxu1 %v2013_v36  ;;  %1673 = vmatpush3.bf16.msra.mxu0 %v1825_v11 }
  0x3e   :  { %1713 = vmatpush3.bf16.msra.mxu1 %v1826_v12  ;;  %1674 = vmatprep.subr.bf16.mxu0 %v1827_v13 }
  0x3f   :  { %1714 = vmatprep.subr.bf16.mxu1 %v1828_v14  ;;  %724 = vperm.xlu1 %1742, %v54_v29  }
  0x41   :  { %1675 = vmatpush3.bf16.msra.mxu0 %v1829_v15 }
  0x42   :  { %1715 = vmatpush3.bf16.msra.mxu1 %v1830_v16 }
  0x43   :  { %686 = vperm.xlu1 %1742, %v48_v30  }
  0x44   :  { %1113 = vmatmul.mubr.bf16.vlgmr.msra.gmra.mrb[16].mxu0 %v1998_v33 }
  0x45   :  { %1178 = vmatmul.mubr.bf16.vlgmr.msra.gmra.mrb[16].mxu1 %v2008_v35  ;;  %1120 = vmatprep.mubr.bf16.mxu0 %v2046_v45 }
  0x46   :  { %1185 = vmatprep.mubr.bf16.mxu1 %v2051_v46 }
  0x4c   :  { %1121 = vmatmul.mubr.bf16.gmra.mrb[20].mxu0 %v2056_v47 }
  0x4d   :  { %1186 = vmatmul.mubr.bf16.gmra.mrb[20].mxu1 %v2062_v48  ;;  %1128 = vmatprep.mubr.bf16.mxu0 %v2094_v57 }
  0x4e   :  { %1193 = vmatprep.mubr.bf16.mxu1 %v2099_v58 }
  0x54   :  { %1129 = vmatmul.mubr.bf16.gmra.mrb[24].mxu0 %v2104_v59 }
  0x55   :  { %1194 = vmatmul.mubr.bf16.gmra.mrb[24].mxu1 %v2109_v60  ;;  %1136 = vmatprep.mubr.bf16.mxu0 %v1817_v5 }
  0x56   :  { %1201 = vmatprep.mubr.bf16.mxu1 %v1819_v6 }
  0x5c   :  { %1137 = vmatmul.mubr.bf16.gmra.mrb[28].mxu0 %v1821_v7 }
  0x5d   :  { %1202 = vmatmul.mubr.bf16.gmra.mrb[28].mxu1 %v1822_v8 }
  0xf6   :  { %v1596_v31 = vpop.f32.mrb[0].mxu0 }
  0xf7   :  { %v1636_v32 = vpop.f32.mrb[0].mxu1  ;;  %v1597_v33 = vpop.f32.mrb[1].mxu0 }
  0xf8   :  { %v1598_v34 = vadd.f32 %v1597_v33, %v1596_v31  ;;  %v1637_v35 = vpop.f32.mrb[1].mxu1  ;;  %v1599_v36 = vpop.f32.mrb[2].mxu0 }
  0xf9   :  { %v1638_v37 = vadd.f32 %v1637_v35, %v1636_v32  ;;  %v1639_v38 = vpop.f32.mrb[2].mxu1  ;;  %v1600_v39 = vpop.f32.mrb[3].mxu0 }
  0xfa   :  { %v1601_v40 = vadd.f32 %v1600_v39, %v1599_v36  ;;  %v1640_v41 = vpop.f32.mrb[3].mxu1 }
  0xfb   :  { %v2229_v42 = vadd.f32 %v1638_v37, %v1598_v34  ;;  %v1641_v43 = vadd.f32 %v1640_v41, %v1639_v38 }
  0xfd   :  { %v2231_v44 = vadd.f32 %v1641_v43, %v1601_v40  ;;  %v533_v45 = vsel %vm532_vm0, %v2229_v42, 0.0  ;;  %v566_v52 = vmul.f32 %v2229_v42, %v2229_v42 }
  0xfe   :  { %534 = vadd.xlane.f32.xlu0 %v533_v45  ;;  %v1602_v47 = vpop.f32.mrb[4].mxu0 }
  0xff   :  { %v567_v46 = vmul.f32 %v2231_v44, %v2231_v44  ;;  %v1642_v48 = vpop.f32.mrb[4].mxu1  ;;  %v1603_v49 = vpop.f32.mrb[5].mxu0  ;;  %v536_v51 = vsel %vm532_vm0, %v2231_v44, 0.0  ;;  %v574_v63 = vsel %vm532_vm0, %v566_v52, 0.0 }
 0x100   :  { %v1604_v53 = vadd.f32 %v1603_v49, %v1602_v47  ;;  %v1643_v54 = vpop.f32.mrb[5].mxu1  ;;  %v1605_v55 = vpop.f32.mrb[6].mxu0 }
 0x101   :  { %v577_v50 = vsel %vm532_vm0, %v567_v46, 0.0  ;;  %v1644_v56 = vadd.f32 %v1643_v54, %v1642_v48  ;;  %v1645_v57 = vpop.f32.mrb[6].mxu1  ;;  %v1606_v58 = vpop.f32.mrb[7].mxu0 }
 0x102   :  { %578 = vadd.xlane.f32.xlu1 %v577_v50  ;;  %537 = vadd.xlane.f32.xlu0 %v536_v51  ;;  %v1607_v59 = vadd.f32 %v1606_v58, %v1605_v55  ;;  %v1646_v60 = vpop.f32.mrb[7].mxu1 }
 0x103   :  { %v2242_v61 = vadd.f32 %v1644_v56, %v1604_v53  ;;  %v1647_v62 = vadd.f32 %v1646_v60, %v1645_v57 }
 0x105   :  { %v2245_v0 = vadd.f32 %v1647_v62, %v1607_v59  ;;  %v539_v2 = vsel %vm532_vm0, %v2242_v61, 0.0  ;;  %v568_v4 = vmul.f32 %v2242_v61, %v2242_v61 }
 0x106   :  { %575 = vadd.xlane.f32.xlu0 %v574_v63  ;;  %v1608_v5 = vpop.f32.mrb[8].mxu0 }
 0x107   :  { %v542_v1 = vsel %vm532_vm0, %v2245_v0, 0.0  ;;  %v569_v3 = vmul.f32 %v2245_v0, %v2245_v0  ;;  %v1648_v6 = vpop.f32.mrb[8].mxu1  ;;  %v1609_v7 = vpop.f32.mrb[9].mxu0  ;;  %v580_v12 = vsel %vm532_vm0, %v568_v4, 0.0 }
 0x108   :  { %543 = vadd.xlane.f32.xlu1 %v542_v1  ;;  %v1610_v8 = vadd.f32 %v1609_v7, %v1608_v5  ;;  %v1649_v9 = vpop.f32.mrb[9].mxu1  ;;  %v1611_v10 = vpop.f32.mrb[10].mxu0 }
 0x109   :  { %v583_v11 = vsel %vm532_vm0, %v569_v3, 0.0  ;;  %v1650_v13 = vadd.f32 %v1649_v9, %v1648_v6  ;;  %v1651_v14 = vpop.f32.mrb[10].mxu1  ;;  %v1612_v15 = vpop.f32.mrb[11].mxu0 }
 0x10a   :  { %540 = vadd.xlane.f32.xlu0 %v539_v2  ;;  %v1613_v16 = vadd.f32 %v1612_v15, %v1611_v10  ;;  %v1652_v17 = vpop.f32.mrb[11].mxu1 }
 0x10b   :  { %v2257_v18 = vadd.f32 %v1650_v13, %v1610_v8  ;;  %v1653_v19 = vadd.f32 %v1652_v17, %v1651_v14 }
 0x10c   :  { %584 = vadd.xlane.f32.xlu1 %v583_v11 }
 0x10d   :  { %v2259_v20 = vadd.f32 %v1653_v19, %v1613_v16  ;;  %v545_v21 = vsel %vm532_vm0, %v2257_v18, 0.0  ;;  %v570_v22 = vmul.f32 %v2257_v18, %v2257_v18 }
 0x10e   :  { %581 = vadd.xlane.f32.xlu0 %v580_v12  ;;  %v1614_v25 = vpop.f32.mrb[12].mxu0 }
 0x10f   :  { %v548_v23 = vsel %vm532_vm0, %v2259_v20, 0.0  ;;  %v571_v24 = vmul.f32 %v2259_v20, %v2259_v20  ;;  %v1654_v26 = vpop.f32.mrb[12].mxu1  ;;  %v586_v27 = vsel %vm532_vm0, %v570_v22, 0.0  ;;  %v1615_v28 = vpop.f32.mrb[13].mxu0 }
 0x110   :  { %549 = vadd.xlane.f32.xlu1 %v548_v23  ;;  %v1655_v29 = vpop.f32.mrb[13].mxu1  ;;  %v1616_v30 = vadd.f32 %v1615_v28, %v1614_v25  ;;  %v1617_v32 = vpop.f32.mrb[14].mxu0 }
 0x111   :  { %v1656_v31 = vadd.f32 %v1655_v29, %v1654_v26  ;;  %v1657_v33 = vpop.f32.mrb[14].mxu1  ;;  %v589_v34 = vsel %vm532_vm0, %v571_v24, 0.0  ;;  %v1618_v35 = vpop.f32.mrb[15].mxu0 }
 0x112   :  { %546 = vadd.xlane.f32.xlu0 %v545_v21  ;;  %v1658_v36 = vpop.f32.mrb[15].mxu1  ;;  %v1619_v38 = vadd.f32 %v1618_v35, %v1617_v32 }
 0x113   :  { %v2271_v37 = vadd.f32 %v1656_v31, %v1616_v30  ;;  %v1659_v39 = vadd.f32 %v1658_v36, %v1657_v33 }
 0x114   :  { %590 = vadd.xlane.f32.xlu1 %v589_v34 }
 0x115   :  { %v2273_v40 = vadd.f32 %v1659_v39, %v1619_v38  ;;  %v551_v41 = vsel %vm532_vm0, %v2271_v37, 0.0  ;;  %v572_v43 = vmul.f32 %v2271_v37, %v2271_v37 }
 0x116   :  { %587 = vadd.xlane.f32.xlu0 %v586_v27 }
 0x117   :  { %v554_v45 = vsel %vm532_vm0, %v2273_v40, 0.0  ;;  %v573_v46 = vmul.f32 %v2273_v40, %v2273_v40  ;;  %v1676_v47 = vpop.f32.mrb[16].mxu0  ;;  %v592_v48 = vsel %vm532_vm0, %v572_v43, 0.0 }
 0x118   :  { %555 = vadd.xlane.f32.xlu1 %v554_v45  ;;  %v1716_v49 = vpop.f32.mrb[16].mxu1  ;;  %v1677_v50 = vpop.f32.mrb[17].mxu0 }
 0x119   :  { %v1678_v51 = vadd.f32 %v1677_v50, %v1676_v47  ;;  %v1717_v52 = vpop.f32.mrb[17].mxu1  ;;  %v1679_v53 = vpop.f32.mrb[18].mxu0  ;;  %v595_v54 = vsel %vm532_vm0, %v573_v46, 0.0 }
 0x11a   :  { %552 = vadd.xlane.f32.xlu0 %v551_v41  ;;  %v1718_v55 = vadd.f32 %v1717_v52, %v1716_v49  ;;  %v1719_v56 = vpop.f32.mrb[18].mxu1  ;;  %v1680_v57 = vpop.f32.mrb[19].mxu0 }
 0x11b   :  { %v1681_v58 = vadd.f32 %v1680_v57, %v1679_v53  ;;  %v1720_v59 = vpop.f32.mrb[19].mxu1 }
 0x11c   :  { %596 = vadd.xlane.f32.xlu1 %v595_v54  ;;  %v2285_v60 = vadd.f32 %v1718_v55, %v1678_v51  ;;  %v1721_v62 = vadd.f32 %v1720_v59, %v1719_v56 }
 0x11e   :  { %593 = vadd.xlane.f32.xlu0 %v592_v48  ;;  %v2287_v63 = vadd.f32 %v1721_v62, %v1681_v58  ;;  %v1210_v1 = vsel %vm532_vm0, %v2285_v60, 0.0  ;;  %v1242_v2 = vmul.f32 %v2285_v60, %v2285_v60 }
 0x11f   :  { %v1682_v3 = vpop.f32.mrb[20].mxu0 }
 0x120   :  { %1211 = vadd.xlane.f32.xlu1 %v1210_v1  ;;  %v1722_v4 = vpop.f32.mrb[20].mxu1  ;;  %v1683_v5 = vpop.f32.mrb[21].mxu0  ;;  %v1250_v6 = vsel %vm532_vm0, %v1242_v2, 0.0  ;;  %v1213_v13 = vsel %vm532_vm0, %v2287_v63, 0.0  ;;  %v1243_v14 = vmul.f32 %v2287_v63, %v2287_v63 }
 0x121   :  { %v1684_v7 = vadd.f32 %v1683_v5, %v1682_v3  ;;  %v1723_v8 = vpop.f32.mrb[21].mxu1  ;;  %v1685_v9 = vpop.f32.mrb[22].mxu0 }
 0x122   :  { %1251 = vadd.xlane.f32.xlu0 %v1250_v6  ;;  %v1724_v10 = vadd.f32 %v1723_v8, %v1722_v4  ;;  %v1725_v11 = vpop.f32.mrb[22].mxu1  ;;  %v1686_v12 = vpop.f32.mrb[23].mxu0  ;;  %v1253_v23 = vsel %vm532_vm0, %v1243_v14, 0.0  ;;  %v56_v14 = vld [vmem:[%s2560_s3 + $0x30] sm:$0xff] }
 0x123   :  { %v1687_v15 = vadd.f32 %v1686_v12, %v1685_v9  ;;  %v1726_v16 = vpop.f32.mrb[23].mxu1 }
 0x124   :  { %1214 = vadd.xlane.f32.xlu1 %v1213_v13  ;;  %v2298_v17 = vadd.f32 %v1724_v10, %v1684_v7  ;;  %v1727_v19 = vadd.f32 %v1726_v16, %v1725_v11  ;;  %v2341_v13 = vpop.permute.xlu1 %661 }
 0x126   :  { %v2300_v21 = vadd.f32 %v1727_v19, %v1687_v15  ;;  %v1216_v22 = vsel %vm532_vm0, %v2298_v17, 0.0  ;;  %v1244_v24 = vmul.f32 %v2298_v17, %v2298_v17  ;;  %v57_v15 = vld [vmem:[%s2560_s3 + $0x38] sm:$0xff] }
 0x127   :  { %1217 = vadd.xlane.f32.xlu0 %v1216_v22  ;;  %v1688_v25 = vpop.f32.mrb[24].mxu0 }
 0x128   :  { %1254 = vadd.xlane.f32.xlu1 %v1253_v23  ;;  %v1728_v26 = vpop.f32.mrb[24].mxu1  ;;  %v1689_v27 = vpop.f32.mrb[25].mxu0  ;;  %v1256_v28 = vsel %vm532_vm0, %v1244_v24, 0.0  ;;  %v1219_v35 = vsel %vm532_vm0, %v2300_v21, 0.0  ;;  %v1245_v36 = vmul.f32 %v2300_v21, %v2300_v21 }
 0x129   :  { %v1690_v29 = vadd.f32 %v1689_v27, %v1688_v25  ;;  %v1729_v30 = vpop.f32.mrb[25].mxu1  ;;  %v1691_v31 = vpop.f32.mrb[26].mxu0 }
 0x12a   :  { %v1730_v32 = vadd.f32 %v1729_v30, %v1728_v26  ;;  %v1731_v33 = vpop.f32.mrb[26].mxu1  ;;  %v1692_v34 = vpop.f32.mrb[27].mxu0  ;;  %v1259_v47 = vsel %vm532_vm0, %v1245_v36, 0.0 }
 0x12b   :  { %1257 = vadd.xlane.f32.xlu0 %v1256_v28  ;;  %v1693_v38 = vadd.f32 %v1692_v34, %v1691_v31  ;;  %v1732_v39 = vpop.f32.mrb[27].mxu1  ;;  %v2349_v16 = vpop.permute.xlu1 %666 }
 0x12c   :  { %1220 = vadd.xlane.f32.xlu1 %v1219_v35  ;;  %v2312_v41 = vadd.f32 %v1730_v32, %v1690_v29  ;;  %v1733_v43 = vadd.f32 %v1732_v39, %v1731_v33  ;;  %v2359_v25 = vpop.permute.xlu0 %656 }
 0x12e   :  { %v2314_v45 = vadd.f32 %v1733_v43, %v1693_v38  ;;  %v1222_v46 = vsel %vm532_vm0, %v2312_v41, 0.0  ;;  %v1246_v48 = vmul.f32 %v2312_v41, %v2312_v41 }
 0x12f   :  { %1223 = vadd.xlane.f32.xlu0 %v1222_v46  ;;  %v1694_v49 = vpop.f32.mrb[28].mxu0  ;;  %v2351_v19 = vpop.permute.xlu1 %671 }
 0x130   :  { %1260 = vadd.xlane.f32.xlu1 %v1259_v47  ;;  %v1734_v50 = vpop.f32.mrb[28].mxu1  ;;  %v1695_v51 = vpop.f32.mrb[29].mxu0  ;;  %v1262_v52 = vsel %vm532_vm0, %v1246_v48, 0.0  ;;  %v1225_v59 = vsel %vm532_vm0, %v2314_v45, 0.0  ;;  %v1247_v62 = vmul.f32 %v2314_v45, %v2314_v45 }
 0x131   :  { %v1696_v53 = vadd.f32 %v1695_v51, %v1694_v49  ;;  %v1735_v54 = vpop.f32.mrb[29].mxu1  ;;  %v1697_v55 = vpop.f32.mrb[30].mxu0 }
 0x132   :  { %v1736_v56 = vadd.f32 %v1735_v54, %v1734_v50  ;;  %v1737_v57 = vpop.f32.mrb[30].mxu1  ;;  %v1698_v58 = vpop.f32.mrb[31].mxu0  ;;  %v1265_v7 = vsel %vm532_vm0, %v1247_v62, 0.0 }
 0x133   :  { %1263 = vadd.xlane.f32.xlu0 %v1262_v52  ;;  %v1699_v1 = vadd.f32 %v1698_v58, %v1697_v55  ;;  %v1738_v2 = vpop.f32.mrb[31].mxu1  ;;  %v2353_v22 = vpop.permute.xlu1 %704 }
 0x134   :  { %1226 = vadd.xlane.f32.xlu1 %v1225_v59  ;;  %v2326_v3 = vadd.f32 %v1736_v56, %v1696_v53  ;;  %v1739_v4 = vadd.f32 %v1738_v2, %v1737_v57  ;;  %v2363_v27 = vpop.permute.xlu0 %681 }
 0x136   :  { %v2328_v5 = vadd.f32 %v1739_v4, %v1699_v1  ;;  %v1228_v6 = vsel %vm532_vm0, %v2326_v3, 0.0  ;;  %v1248_v8 = vmul.f32 %v2326_v3, %v2326_v3 }
 0x137   :  { %1229 = vadd.xlane.f32.xlu0 %v1228_v6  ;;  %v2355_v23 = vpop.permute.xlu1 %709 }
 0x138   :  { %1266 = vadd.xlane.f32.xlu1 %v1265_v7  ;;  %v1268_v9 = vsel %vm532_vm0, %v1248_v8, 0.0  ;;  %v1231_v10 = vsel %vm532_vm0, %v2328_v5, 0.0  ;;  %v1249_v11 = vmul.f32 %v2328_v5, %v2328_v5  ;;  %v2367_v29 = vpop.permute.xlu0 %729 }
 0x13a   :  { %v1271_v12 = vsel %vm532_vm0, %v1249_v11, 0.0 }
 0x13b   :  { %1269 = vadd.xlane.f32.xlu0 %v1268_v9  ;;  %v2357_v24 = vpop.permute.xlu1 %714 }
 0x13c   :  { %1232 = vadd.xlane.f32.xlu1 %v1231_v10  ;;  %v2371_v31 = vpop.permute.xlu0 %691 }
 0x13f   :  { %v2361_v26 = vpop.permute.xlu1 %719 }
 0x140   :  { %1272 = vadd.xlane.f32.xlu1 %v1271_v12 }
 0x143   :  { %v2365_v28 = vpop.permute.xlu1 %676 }
 0x147   :  { %v2369_v30 = vpop.permute.xlu1 %724 }
 0x14b   :  { %v2373_v32 = vpop.permute.xlu1 %686 }
 0x151   :  { %734 = vperm.xlu1 %1742, %v56_v14   ;;  %739 = vperm.xlu0 %1741, %v57_v15  }
 0x18b   :  { %v535_v33 = vpop.xlane.xlu0 %534 }
 0x18c   :  { %v558_v36 = vmul.f32 0.0625, %v535_v33 }
 0x18e   :  { %v606_v47 = vmul.f32 %v558_v36, %v558_v36 }
 0x18f   :  { %v579_v34 = vpop.xlane.xlu1 %578  ;;  %v538_v35 = vpop.xlane.xlu0 %537 }
 0x190   :  { %v559_v38 = vmul.f32 0.0625, %v538_v35  ;;  %v599_v39 = vmul.f32 0.0625, %v579_v34  ;;  %v638_v35 = vsub.f32 %v2229_v42, %v558_v36 }
 0x192   :  { %v607_v43 = vmul.f32 %v559_v38, %v559_v38  ;;  %v639_v10 = vsub.f32 %v2231_v44, %v559_v38 }
 0x193   :  { %v576_v46 = vpop.xlane.xlu0 %575 }
 0x194   :  { %v615_v48 = vsub.f32 %v599_v39, %v607_v43  ;;  %v598_v49 = vmul.f32 0.0625, %v576_v46 }
 0x195   :  { %v544_v52 = vpop.xlane.xlu1 %543 }
 0x196   :  { %v623_v50 = vadd.f32 1e-05, %v615_v48  ;;  %v614_v51 = vsub.f32 %v598_v49, %v606_v47  ;;  %v561_v55 = vmul.f32 0.0625, %v544_v52 }
 0x197   :  { %v541_v53 = vpop.xlane.xlu0 %540 }
 0x198   :  { %1831 = vrsqrt.f32 %v623_v50  ;;  %v622_v54 = vadd.f32 1e-05, %v614_v51  ;;  %v560_v56 = vmul.f32 0.0625, %v541_v53  ;;  %v609_v59 = vmul.f32 %v561_v55, %v561_v55 }
 0x199   :  { %v585_v57 = vpop.xlane.xlu1 %584 }
 0x19a   :  { %1833 = vrsqrt.f32 %v622_v54  ;;  %v608_v62 = vmul.f32 %v560_v56, %v560_v56  ;;  %v601_v1 = vmul.f32 0.0625, %v585_v57 }
 0x19b   :  { %v582_v58 = vpop.xlane.xlu0 %581 }
 0x19c   :  { %v600_v2 = vmul.f32 0.0625, %v582_v58  ;;  %v617_v4 = vsub.f32 %v601_v1, %v609_v59  ;;  %v640_v1 = vsub.f32 %v2242_v61, %v560_v56  ;;  %v2401_v61 = vld [vmem:[%s2561_s4] sm:$0xff] }
 0x19d   :  { %v550_v14 = vpop.xlane.xlu1 %549 }
 0x19e   :  { %v616_v6 = vsub.f32 %v600_v2, %v608_v62  ;;  %v625_v7 = vadd.f32 1e-05, %v617_v4  ;;  %v2378_v33 = vmul.f32 0.0625, %v550_v14  ;;  %v641_v62 = vsub.f32 %v2245_v0, %v561_v55  ;;  %v2396_v0 = vld [vmem:[%s2561_s4 + $0x8] sm:$0xff] }
 0x19f   :  { %v547_v9 = vpop.xlane.xlu0 %546 }
 0x1a0   :  { %v624_v8 = vadd.f32 1e-05, %v616_v6  ;;  %v2376_v11 = vmul.f32 0.0625, %v547_v9  ;;  %1835 = vrsqrt.f32 %v625_v7  ;;  %v611_v49 = vmul.f32 %v2378_v33, %v2378_v33 }
 0x1a1   :  { %v591_v44 = vpop.xlane.xlu1 %590 }
 0x1a2   :  { %v1832_v12 = vpop.eup %1831  ;;  %1837 = vrsqrt.f32 %v624_v8  ;;  %v610_v46 = vmul.f32 %v2376_v11, %v2376_v11  ;;  %v603_v50 = vmul.f32 0.0625, %v591_v44 }
 0x1a3   :  { %v647_v15 = vmul.f32 %v1832_v12, %v639_v10  ;;  %v588_v39 = vpop.xlane.xlu0 %587 }
 0x1a4   :  { %v1834_v34 = vpop.eup %1833  ;;  %v602_v47 = vmul.f32 0.0625, %v588_v39  ;;  %v619_v53 = vsub.f32 %v603_v50, %v611_v49  ;;  %v643_v49 = vsub.f32 %v2259_v20, %v2378_v33  ;;  %v642_v50 = vsub.f32 %v2257_v18, %v2376_v11 }
 0x1a5   :  { %v695_v43 = vmul.f32 %v2341_v13, %v647_v15  ;;  %v646_v38 = vmul.f32 %v1834_v34, %v638_v35  ;;  %v556_v2 = vpop.xlane.xlu1 %555 }
 0x1a6   :  { %v618_v51 = vsub.f32 %v602_v47, %v610_v46  ;;  %v627_v57 = vadd.f32 1e-05, %v619_v53  ;;  %v2417_v20 = vmul.f32 0.0625, %v556_v2  ;;  %v2429_v2 = vld [vmem:[%s2561_s4 + $0x10] sm:$0xff] }
 0x1a7   :  { %v743_v48 = vadd.f32 %v2355_v23, %v695_v43  ;;  %v694_v52 = vmul.f32 %v2359_v25, %v646_v38  ;;  %v553_v58 = vpop.xlane.xlu0 %552 }
 0x1a8   :  { %v626_v42 = vadd.f32 1e-05, %v618_v51  ;;  %v2411_v51 = vmul.f32 0.0625, %v553_v58 }
 0x1a9   :  { %v742_v36 = vadd.f32 %v2353_v22, %v694_v52  ;;  %v751_v54 = vmul.f32 0.2, %v743_v48  ;;  %v597_v12 = vpop.xlane.xlu1 %596 }
 0x1aa   :  { %1839 = vrsqrt.f32 %v626_v42  ;;  %v1836_v59 = vpop.eup %1835 }
 0x1ab   :  { %v750_v4 = vmul.f32 0.2, %v742_v36  ;;  %1841 = vrsqrt.f32 %v627_v57  ;;  %v759_v8 = vmax.f32 %v743_v48, %v751_v54  ;;  %v649_v10 = vmul.f32 %v1836_v59, %v641_v62  ;;  %v594_v35 = vpop.xlane.xlu0 %593 }
 0x1ac   :  { %v1838_v6 = vpop.eup %1837  ;;  %v604_v58 = vmul.f32 0.0625, %v594_v35 }
 0x1ad   :  { %v758_v7 = vmax.f32 %v742_v36, %v750_v4  ;;  %v648_v9 = vmul.f32 %v1838_v6, %v640_v1  ;;  %v697_v34 = vmul.f32 %v2351_v19, %v649_v10  ;;  %v1212_v52 = vpop.xlane.xlu1 %1211 }
 0x1ae   :  { %v2413_v53 = vmul.f32 0.0625, %v1212_v52 }
 0x1af   :  { %v766_v14 = vpack.c.bf16 %v759_v8, %v758_v7  ;;  %v696_v15 = vmul.f32 %v2349_v16, %v648_v9  ;;  %v745_v43 = vadd.f32 %v2361_v26, %v697_v34  ;;  %v1252_v59 = vpop.xlane.xlu0 %1251  ;;  %v612_v8 = vmul.f32 %v2411_v51, %v2411_v51 }
 0x1b0   :  { %v1282_v18 = vmul.f32 %v2413_v53, %v2413_v53  ;;  %v1274_v11 = vmul.f32 0.0625, %v1252_v59 }
 0x1b1   :  { %v771_v55 = vunpack.c.h.bf16 %v766_v14  ;;  %v770_v56 = vunpack.c.l.bf16 %v766_v14  ;;  %v744_v39 = vadd.f32 %v2357_v24, %v696_v15  ;;  %v753_v38 = vmul.f32 0.2, %v745_v43  ;;  %v1215_v4 = vpop.xlane.xlu1 %1214 }
 0x1b2   :  { %v1290_v9 = vsub.f32 %v1274_v11, %v1282_v18  ;;  %v2424_v10 = vmul.f32 0.0625, %v1215_v4  ;;  %v605_v15 = vmul.f32 0.0625, %v597_v12 }
 0x1b3   :  { %v779_v46 = vmul.f32 %v771_v55, %v2396_v0  ;;  %v778_v47 = vmul.f32 %v770_v56, %v2401_v61  ;;  %v752_v44 = vmul.f32 0.2, %v744_v39  ;;  %v761_v62 = vmax.f32 %v745_v43, %v753_v38  ;;  %v2438_v43 = vld [vmem:[%s2561_s4 + $0x18] sm:$0xff] }
 0x1b4   :  { %v1840_v48 = vpop.eup %1839  ;;  %v613_v56 = vmul.f32 %v2417_v20, %v2417_v20  ;;  %v1218_v12 = vpop.xlane.xlu0 %1217 }
 0x1b5   :  { %v789_v42 = vsel %vm532_vm0, %v779_v46, 0.0  ;;  %v786_v36 = vsel %vm532_vm0, %v778_v47, 0.0  ;;  %v760_v54 = vmax.f32 %v744_v39, %v752_v44  ;;  %v1842_v57 = vpop.eup %1841  ;;  %v650_v1 = vmul.f32 %v1840_v48, %v642_v50  ;;  %v1255_v38 = vpop.xlane.xlu1 %1254 }
 0x1b6   :  { %790 = vadd.xlane.f32.xlu0 %v789_v42  ;;  %787 = vadd.xlane.f32.xlu1 %v786_v36  ;;  %v651_v33 = vmul.f32 %v1842_v57, %v643_v49  ;;  %v1298_v39 = vadd.f32 1e-05, %v1290_v9  ;;  %v620_v47 = vsub.f32 %v604_v58, %v612_v8  ;;  %v1283_v44 = vmul.f32 %v2424_v10, %v2424_v10 }
 0x1b7   :  { %v767_v6 = vpack.c.bf16 %v761_v62, %v760_v54  ;;  %v698_v7 = vmul.f32 %v2365_v28, %v650_v1  ;;  %v2444_v50 = vmul.f32 0.0625, %v1218_v12  ;;  %v1275_v52 = vmul.f32 0.0625, %v1255_v38 }
 0x1b8   :  { %v699_v14 = vmul.f32 %v2363_v27, %v651_v33  ;;  %1843 = vrsqrt.f32 %v1298_v39  ;;  %v621_v36 = vsub.f32 %v605_v15, %v613_v56  ;;  %v628_v11 = vadd.f32 1e-05, %v620_v47  ;;  %v1258_v33 = vpop.xlane.xlu0 %1257 }
 0x1b9   :  { %v772_v34 = vunpack.c.l.bf16 %v767_v6  ;;  %v773_v35 = vunpack.c.h.bf16 %v767_v6  ;;  %v746_v55 = vadd.f32 %v2369_v30, %v698_v7  ;;  %v1284_v62 = vmul.f32 %v2444_v50, %v2444_v50  ;;  %v1221_v58 = vpop.xlane.xlu1 %1220 }
 0x1ba   :  { %v747_v46 = vadd.f32 %v2367_v29, %v699_v14  ;;  %v1291_v1 = vsub.f32 %v1275_v52, %v1283_v44  ;;  %v1276_v6 = vmul.f32 0.0625, %v1258_v33  ;;  %v2450_v7 = vmul.f32 0.0625, %v1221_v58 }
 0x1bb   :  { %v780_v48 = vmul.f32 %v772_v34, %v2429_v2  ;;  %v754_v49 = vmul.f32 0.2, %v746_v55  ;;  %v781_v57 = vmul.f32 %v773_v35, %v2438_v43  ;;  %v629_v9 = vadd.f32 1e-05, %v621_v36  ;;  %v2458_v34 = vld [vmem:[%s2561_s4 + $0x20] sm:$0xff] }
 0x1bc   :  { %v755_v42 = vmul.f32 0.2, %v747_v46  ;;  %v1299_v4 = vadd.f32 1e-05, %v1291_v1  ;;  %v1292_v15 = vsub.f32 %v1276_v6, %v1284_v62  ;;  %v1224_v35 = vpop.xlane.xlu0 %1223  ;;  %v1314_v12 = vsub.f32 %v2285_v60, %v2413_v53 }
 0x1bd   :  { %v792_v54 = vsel %vm532_vm0, %v780_v48, 0.0  ;;  %v762_v59 = vmax.f32 %v746_v55, %v754_v49  ;;  %v795_v14 = vsel %vm532_vm0, %v781_v57, 0.0  ;;  %v1261_v55 = vpop.xlane.xlu1 %1260  ;;  %v2463_v47 = vmul.f32 0.0625, %v1224_v35 }
 0x1be   :  { %793 = vadd.xlane.f32.xlu0 %v792_v54  ;;  %v763_v18 = vmax.f32 %v747_v46, %v755_v42  ;;  %1845 = vrsqrt.f32 %v1299_v4  ;;  %v1300_v39 = vadd.f32 1e-05, %v1292_v15  ;;  %v1285_v46 = vmul.f32 %v2450_v7, %v2450_v7 }
 0x1bf   :  { %1847 = vrsqrt.f32 %v628_v11  ;;  %v1277_v44 = vmul.f32 0.0625, %v1261_v55  ;;  %v1286_v49 = vmul.f32 %v2463_v47, %v2463_v47 }
 0x1c0   :  { %v2452_v8 = vpack.c.bf16 %v763_v18, %v762_v59  ;;  %1849 = vrsqrt.f32 %v629_v9  ;;  %v1264_v42 = vpop.xlane.xlu0 %1263  ;;  %v1315_v18 = vsub.f32 %v2287_v63, %v2424_v10  ;;  %v644_v10 = vsub.f32 %v2271_v37, %v2411_v51 }
 0x1c1   :  { %1851 = vrsqrt.f32 %v1300_v39  ;;  %v1293_v52 = vsub.f32 %v1277_v44, %v1285_v46  ;;  %v1227_v36 = vpop.xlane.xlu1 %1226  ;;  %v1278_v62 = vmul.f32 0.0625, %v1264_v42  ;;  %v1316_v39 = vsub.f32 %v2298_v17, %v2444_v50 }
 0x1c2   :  { %796 = vadd.xlane.f32.xlu0 %v795_v14  ;;  %v774_v56 = vunpack.c.l.bf16 %v2452_v8  ;;  %v1844_v48 = vpop.eup %1843  ;;  %v2471_v1 = vmul.f32 0.0625, %v1227_v36  ;;  %v1317_v50 = vsub.f32 %v2300_v21, %v2450_v7 }
 0x1c3   :  { %v1322_v57 = vmul.f32 %v1844_v48, %v1314_v12  ;;  %v1301_v59 = vadd.f32 1e-05, %v1293_v52  ;;  %v1294_v53 = vsub.f32 %v1278_v62, %v1286_v49 }
 0x1c4   :  { %v782_v38 = vmul.f32 %v774_v56, %v2458_v34  ;;  %v1230_v11 = vpop.xlane.xlu0 %1229  ;;  %v1287_v6 = vmul.f32 %v2471_v1, %v2471_v1 }
 0x1c5   :  { %v1330_v60 = vmul.f32 %v1322_v57, %v2359_v25  ;;  %1853 = vrsqrt.f32 %v1301_v59  ;;  %v1267_v33 = vpop.xlane.xlu1 %1266  ;;  %v1302_v4 = vadd.f32 1e-05, %v1294_v53  ;;  %v2478_v9 = vmul.f32 0.0625, %v1230_v11 }
 0x1c6   :  { %v798_v54 = vsel %vm532_vm0, %v782_v38, 0.0  ;;  %v1279_v14 = vmul.f32 0.0625, %v1267_v33 }
 0x1c7   :  { %799 = vadd.xlane.f32.xlu0 %v798_v54  ;;  %v1338_v55 = vadd.f32 %v1330_v60, %v2353_v22  ;;  %1855 = vrsqrt.f32 %v1302_v4  ;;  %v1288_v25 = vmul.f32 %v2478_v9, %v2478_v9  ;;  %v645_v22 = vsub.f32 %v2273_v40, %v2417_v20 }
 0x1c8   :  { %v1846_v58 = vpop.eup %1845  ;;  %v1295_v56 = vsub.f32 %v1279_v14, %v1287_v6  ;;  %v1270_v46 = vpop.xlane.xlu0 %1269  ;;  %v1318_v4 = vsub.f32 %v2312_v41, %v2463_v47 }
 0x1c9   :  { %v1848_v15 = vpop.eup %1847  ;;  %v1323_v35 = vmul.f32 %v1846_v58, %v1315_v18  ;;  %v1233_v44 = vpop.xlane.xlu1 %1232  ;;  %v1280_v49 = vmul.f32 0.0625, %v1270_v46  ;;  %v1346_v36 = vmul.f32 0.2, %v1338_v55 }
 0x1ca   :  { %v1850_v63 = vpop.eup %1849  ;;  %v1303_v48 = vadd.f32 1e-05, %v1295_v56  ;;  %v2490_v52 = vmul.f32 0.0625, %v1233_v44  ;;  %v652_v17 = vmul.f32 %v1848_v15, %v644_v10 }
 0x1cb   :  { %v1331_v12 = vmul.f32 %v1323_v35, %v2341_v13  ;;  %v1852_v38 = vpop.eup %1851  ;;  %v1296_v37 = vsub.f32 %v1280_v49, %v1288_v25  ;;  %v653_v51 = vmul.f32 %v1850_v63, %v645_v22  ;;  %v1354_v53 = vmax.f32 %v1338_v55, %v1346_v36 }
 0x1cc   :  { %v1324_v54 = vmul.f32 %v1852_v38, %v1316_v39  ;;  %1857 = vrsqrt.f32 %v1303_v48  ;;  %v1289_v62 = vmul.f32 %v2490_v52, %v2490_v52  ;;  %v700_v7 = vmul.f32 %v2373_v32, %v652_v17 }
 0x1cd   :  { %v1339_v42 = vadd.f32 %v1331_v12, %v2355_v23  ;;  %v1273_v13 = vpop.xlane.xlu1 %1272  ;;  %v1304_v20 = vadd.f32 1e-05, %v1296_v37  ;;  %v775_v23 = vunpack.c.h.bf16 %v2452_v8  ;;  %v701_v21 = vmul.f32 %v2371_v31, %v653_v51 }
 0x1ce   :  { %v1332_v59 = vmul.f32 %v1324_v54, %v2349_v16  ;;  %v1281_v60 = vmul.f32 0.0625, %v1273_v13  ;;  %v2505_v16 = vld [vmem:[%s2561_s4 + $0x28] sm:$0xff]  ;;  %v1319_v12 = vsub.f32 %v2314_v45, %v2471_v1  ;;  %v64_v1 = vld [vmem:[%s2561_s4 + $0x30] sm:$0xff] }
 0x1cf   :  { %v1347_v57 = vmul.f32 0.2, %v1339_v42  ;;  %v1854_v40 = vpop.eup %1853  ;;  %1859 = vrsqrt.f32 %v1304_v20  ;;  %v783_v39 = vmul.f32 %v775_v23, %v2505_v16 }
 0x1d0   :  { %v1325_v11 = vmul.f32 %v1854_v40, %v1317_v50  ;;  %v1340_v33 = vadd.f32 %v1332_v59, %v2357_v24  ;;  %v1297_v58 = vsub.f32 %v1281_v60, %v1289_v62  ;;  %v2509_v8 = vpop.permute.xlu0 %739 }
 0x1d1   :  { %v1355_v18 = vmax.f32 %v1339_v42, %v1347_v57  ;;  %v735_v6 = vpop.permute.xlu1 %734  ;;  %v1856_v15 = vpop.eup %1855  ;;  %v749_v55 = vadd.f32 %v2509_v8, %v701_v21  ;;  %v801_v57 = vsel %vm532_vm0, %v783_v39, 0.0 }
 0x1d2   :  { %v1333_v24 = vmul.f32 %v1325_v11, %v2351_v19  ;;  %v1305_v35 = vadd.f32 1e-05, %v1297_v58  ;;  %v748_v25 = vadd.f32 %v735_v6, %v700_v7  ;;  %v1348_v56 = vmul.f32 0.2, %v1340_v33 }
 0x1d3   :  { %v1362_v14 = vpack.c.bf16 %v1355_v18, %v1354_v53  ;;  %v757_v41 = vmul.f32 0.2, %v749_v55  ;;  %v1326_v44 = vmul.f32 %v1856_v15, %v1318_v4 }
 0x1d4   :  { %v1341_v46 = vadd.f32 %v1333_v24, %v2361_v26  ;;  %1861 = vrsqrt.f32 %v1305_v35  ;;  %v756_v47 = vmul.f32 0.2, %v748_v25  ;;  %v1356_v36 = vmax.f32 %v1340_v33, %v1348_v56 }
 0x1d5   :  { %v1367_v63 = vunpack.c.h.bf16 %v1362_v14  ;;  %v1366_v10 = vunpack.c.l.bf16 %v1362_v14  ;;  %v765_v49 = vmax.f32 %v749_v55, %v757_v41  ;;  %v1334_v54 = vmul.f32 %v1326_v44, %v2365_v28 }
 0x1d6   :  { %v1349_v22 = vmul.f32 0.2, %v1341_v46  ;;  %v1858_v48 = vpop.eup %1857  ;;  %v764_v42 = vmax.f32 %v748_v25, %v756_v47 }
 0x1d7   :  { %v1375_v19 = vmul.f32 %v1367_v63, %v2396_v0  ;;  %v1374_v38 = vmul.f32 %v1366_v10, %v2401_v61  ;;  %v1327_v17 = vmul.f32 %v1858_v48, %v1319_v12  ;;  %v1342_v45 = vadd.f32 %v1334_v54, %v2369_v30  ;;  %v65_v30 = vld [vmem:[%s2561_s4 + $0x38] sm:$0xff] }
 0x1d8   :  { %v1357_v51 = vmax.f32 %v1341_v46, %v1349_v22  ;;  %v769_v50 = vpack.c.bf16 %v765_v49, %v764_v42  ;;  %v1320_v0 = vsub.f32 %v2326_v3, %v2478_v9 }
 0x1d9   :  { %v1385_v26 = vsel %vm532_vm0, %v1375_v19, 0.0  ;;  %v1382_v37 = vsel %vm532_vm0, %v1374_v38, 0.0  ;;  %v1335_v28 = vmul.f32 %v1327_v17, %v2363_v27  ;;  %v1860_v13 = vpop.eup %1859  ;;  %v1350_v23 = vmul.f32 0.2, %v1342_v45 }
 0x1da   :  { %1386 = vadd.xlane.f32.xlu1 %v1385_v26  ;;  %1383 = vadd.xlane.f32.xlu0 %v1382_v37  ;;  %v1363_v61 = vpack.c.bf16 %v1357_v51, %v1356_v36  ;;  %v776_v59 = vunpack.c.l.bf16 %v769_v50  ;;  %v777_v40 = vunpack.c.h.bf16 %v769_v50  ;;  %v1328_v20 = vmul.f32 %v1860_v13, %v1320_v0 }
 0x1db   :  { %v1343_v3 = vadd.f32 %v1335_v28, %v2367_v29  ;;  %v1321_v27 = vsub.f32 %v2328_v5, %v2490_v52  ;;  %v1358_v24 = vmax.f32 %v1342_v45, %v1350_v23  ;;  %v11_v38 = vstv %s2562_s5 }
 0x1dc   :  { %v1368_v62 = vunpack.c.l.bf16 %v1363_v61  ;;  %v1369_v60 = vunpack.c.h.bf16 %v1363_v61  ;;  %v784_v9 = vmul.f32 %v776_v59, %v64_v1  ;;  %v1336_v53 = vmul.f32 %v1328_v20, %v2373_v32  ;;  %12 = vst [vmem:[#allocation2] sm:$0x1] %v11_v38 }
 0x1dd   :  { %v1351_v11 = vmul.f32 0.2, %v1343_v3  ;;  %v785_v21 = vmul.f32 %v777_v40, %v65_v30 }
 0x1de   :  { %802 = vadd.xlane.f32.xlu0 %v801_v57  ;;  %v1376_v18 = vmul.f32 %v1368_v62, %v2429_v2  ;;  %v1862_v33 = vpop.eup %1861  ;;  %v804_v58 = vsel %vm532_vm0, %v784_v9, 0.0  ;;  %v1344_v4 = vadd.f32 %v1336_v53, %v735_v6  ;;  %v1377_v29 = vmul.f32 %v1369_v60, %v2438_v43 }
 0x1df   :  { %v1329_v7 = vmul.f32 %v1862_v33, %v1321_v27  ;;  %v1359_v15 = vmax.f32 %v1343_v3, %v1351_v11  ;;  %v807_v55 = vsel %vm532_vm0, %v785_v21, 0.0 }
 0x1e0   :  { %v1388_v14 = vsel %vm532_vm0, %v1376_v18, 0.0  ;;  %v1352_v52 = vmul.f32 0.2, %v1344_v4  ;;  %v1391_v35 = vsel %vm532_vm0, %v1377_v29, 0.0 }
 0x1e1   :  { %1389 = vadd.xlane.f32.xlu1 %v1388_v14  ;;  %v1337_v5 = vmul.f32 %v1329_v7, %v2371_v31  ;;  %v1364_v32 = vpack.c.bf16 %v1359_v15, %v1358_v24 }
 0x1e2   :  { %805 = vadd.xlane.f32.xlu0 %v804_v58  ;;  %v1360_v10 = vmax.f32 %v1344_v4, %v1352_v52 }
 0x1e3   :  { %v1345_v2 = vadd.f32 %v1337_v5, %v2509_v8  ;;  %v1370_v6 = vunpack.c.l.bf16 %v1364_v32  ;;  %v1371_v25 = vunpack.c.h.bf16 %v1364_v32  ;;  %v1579_v5 = vld [vmem:[#allocation2] ss:$0 sm:$0xff] }
 0x1e5   :  { %1392 = vadd.xlane.f32.xlu1 %v1391_v35  ;;  %v1353_v56 = vmul.f32 0.2, %v1345_v2  ;;  %v1378_v43 = vmul.f32 %v1370_v6, %v2458_v34  ;;  %v1379_v31 = vmul.f32 %v1371_v25, %v2505_v16 }
 0x1e6   :  { %808 = vadd.xlane.f32.xlu0 %v807_v55 }
 0x1e7   :  { %v1361_v63 = vmax.f32 %v1345_v2, %v1353_v56  ;;  %v1394_v39 = vsel %vm532_vm0, %v1378_v43, 0.0  ;;  %v1397_v41 = vsel %vm532_vm0, %v1379_v31, 0.0 }
 0x1e9   :  { %v1365_v46 = vpack.c.bf16 %v1361_v63, %v1360_v10  ;;  %1395 = vadd.xlane.f32.xlu1 %v1394_v39 }
 0x1eb   :  { %v1372_v8 = vunpack.c.l.bf16 %v1365_v46  ;;  %v1373_v47 = vunpack.c.h.bf16 %v1365_v46 }
 0x1ed   :  { %1398 = vadd.xlane.f32.xlu1 %v1397_v41  ;;  %v1380_v44 = vmul.f32 %v1372_v8, %v64_v1  ;;  %v1381_v19 = vmul.f32 %v1373_v47, %v65_v30 }
 0x1ef   :  { %v1400_v12 = vsel %vm532_vm0, %v1380_v44, 0.0  ;;  %v1403_v34 = vsel %vm532_vm0, %v1381_v19, 0.0 }
 0x1f1   :  { %1401 = vadd.xlane.f32.xlu1 %v1400_v12 }
 0x1f5   :  { %1404 = vadd.xlane.f32.xlu1 %v1403_v34 }
 0x243   :  { %v791_v16 = vpop.xlane.xlu0 %790  ;;  %v788_v42 = vpop.xlane.xlu1 %787 }
 0x244   :  { %v810_v37 = vadd.f32 %v791_v16, %v788_v42 }
 0x24b   :  { %v794_v22 = vpop.xlane.xlu0 %793 }
 0x24c   :  { %v811_v51 = vadd.f32 %v810_v37, %v794_v22 }
 0x24f   :  { %v797_v48 = vpop.xlane.xlu0 %796 }
 0x250   :  { %v812_v45 = vadd.f32 %v811_v51, %v797_v48 }
 0x254   :  { %v800_v49 = vpop.xlane.xlu0 %799 }
 0x255   :  { %v813_v0 = vadd.f32 %v812_v45, %v800_v49 }
 0x267   :  { %v1384_v36 = vpop.xlane.xlu0 %1383  ;;  %v1387_v54 = vpop.xlane.xlu1 %1386 }
 0x268   :  { %v1406_v59 = vadd.f32 %v1387_v54, %v1384_v36 }
 0x26b   :  { %v803_v26 = vpop.xlane.xlu0 %802 }
 0x26c   :  { %v814_v1 = vadd.f32 %v813_v0, %v803_v26 }
 0x26e   :  { %v1390_v17 = vpop.xlane.xlu1 %1389 }
 0x26f   :  { %v806_v50 = vpop.xlane.xlu0 %805  ;;  %v1407_v20 = vadd.f32 %v1406_v59, %v1390_v17 }
 0x270   :  { %v815_v13 = vadd.f32 %v814_v1, %v806_v50 }
 0x272   :  { %v1393_v61 = vpop.xlane.xlu1 %1392 }
 0x273   :  { %v809_v28 = vpop.xlane.xlu0 %808  ;;  %v1408_v60 = vadd.f32 %v1407_v20, %v1393_v61 }
 0x274   :  { %v816_v40 = vadd.f32 %v815_v13, %v809_v28 }
 0x276   :  { %v1396_v57 = vpop.xlane.xlu1 %1395  ;;  %v817_v30 = vrot.slane %v816_v40, 4 }
 0x277   :  { %v1409_v3 = vadd.f32 %v1408_v60, %v1396_v57 }
 0x278   :  { %v818_v23 = vadd.f32 %v817_v30, %v816_v40 }
 0x27a   :  { %v1399_v62 = vpop.xlane.xlu1 %1398  ;;  %v819_v11 = vrot.slane %v818_v23, 2 }
 0x27b   :  { %v1410_v27 = vadd.f32 %v1409_v3, %v1399_v62 }
 0x27c   :  { %v820_v21 = vadd.f32 %v819_v11, %v818_v23 }
 0x27e   :  { %v1402_v9 = vpop.xlane.xlu1 %1401  ;;  %v821_v14 = vrot.slane %v820_v21, 1 }
 0x27f   :  { %v1411_v53 = vadd.f32 %v1410_v27, %v1402_v9 }
 0x280   :  { %v822_v15 = vadd.f32 %v821_v14, %v820_v21 }
 0x282   :  { %v1405_v18 = vpop.xlane.xlu1 %1404 }
 0x283   :  { %v1412_v33 = vadd.f32 %v1411_v53, %v1405_v18 }
 0x285   :  { %v1413_v58 = vrot.slane %v1412_v33, 4 }
 0x287   :  { %v1414_v7 = vadd.f32 %v1413_v58, %v1412_v33 }
 0x289   :  { %v1415_v4 = vrot.slane %v1414_v7, 2 }
 0x28b   :  { %v1416_v29 = vadd.f32 %v1415_v4, %v1414_v7 }
 0x28d   :  { %v1417_v24 = vrot.slane %v1416_v29, 1 }
 0x28f   :  { %v1418_v32 = vadd.f32 %v1417_v24, %v1416_v29 }
 0x291   :  { %v1420_v2 = vsel %vm1419_vm1, %v822_v15, %v1418_v32 }
 0x292   :  { %v1428_v52 = vadd.f32 %v1579_v5, %v1420_v2 }
 0x294   :  { %1430 = vst.msk [vmem:[%s2563_s6] sm:$0x3] %vm1429_vm2, %v1428_v52 }

</bundles_post_ra>
